<compile_context>
chip_gen: v7x
topology: tpu7x:2x2x1
jax: 0.10.0
libtpu: 0.0.40
codegen_flags: <defaults>
</compile_context>

<pallas_src>
import functools
import math

import jax
import jax.numpy as jnp
import numpy as np
from jax.experimental import pallas as pl
from jax.experimental.pallas import tpu as pltpu


def _round_up(x, m):
    return (x + m - 1) // m * m


def _pick_batch_block(bp, cap=128):
    """Largest multiple of 8 that divides bp and is <= cap (bp is a multiple of 8)."""
    tb = min(bp, max(cap, 8))
    tb -= tb % 8
    while tb > 8 and bp % tb != 0:
        tb -= 8
    return max(tb, 8)


def _gru_recurrence_kernel(x_ref, len_ref, h0_ref, wih_ref, bfold_ref, whh_ref,
                           bhn_ref, hall_ref, hn_ref, h_scr, *, tq, hp):
    """One grid step == TQ timesteps of the GRU recurrence for one batch block.

    x_ref   : (TQ, TB, Ip)   raw inputs (mxu dtype) -- input projection is fused here
    len_ref : (TB, 1)        int32 sequence lengths
    h0_ref  : (TB, Hp)       initial hidden state (h_init broadcast, zero-padded)
    wih_ref : (Ip, 3*Hp)     input weights, gate blocks (r | z | n), zero-padded
    bfold_ref:(1, 3*Hp)      b_ih + b_hh[r,z] folded, zero-padded (f32)
    whh_ref : (Hp, 3*Hp)     hidden weights, fused gate blocks, zero-padded
    bhn_ref : (1, Hp)        hidden bias of the n gate (must stay inside r * (...))
    hall_ref: (TQ, TB, Hp)   per-step padded outputs (zero past the length)
    hn_ref  : (TB, Hp)       final hidden state (resident output, written at last q)
    h_scr   : (TB, Hp)       VMEM scratch carrying the hidden state across time blocks
    """
    q = pl.program_id(1)                      # time-block index (inner, serial axis)

    @pl.when(q == 0)
    def _():                                  # new batch block: (re)seed the carry
        h_scr[...] = h0_ref[...]

    tb = h_scr.shape[0]
    lens = len_ref[...]                       # (TB, 1) int32, loaded once per block
    wih = wih_ref[...]                        # (Ip, 3*Hp) mxu dtype
    whh = whh_ref[...]                        # (Hp, 3*Hp) mxu dtype
    # Hoist the (1, X) -> (TB, X) bias broadcasts out of the unrolled t loop
    # (JAX does not CSE broadcast_in_dim).
    bias = jnp.broadcast_to(bfold_ref[...], (tb, 3 * hp))   # f32
    bhn = jnp.broadcast_to(bhn_ref[...], (tb, hp))          # f32
    h = h_scr[...]                            # (TB, Hp) f32 carry

    # TQ is a small static constant: a static Python loop gives fully static ref
    # indices (zero-cost views) and full scheduler visibility over the unrolled
    # recurrence.  (For much larger TB*Hp tiles switch to lax.fori_loop with a
    # modest unroll to bound vreg live ranges.)
    for t in range(tq):
        t_global = q * tq + t
        # Fused input projection -- independent of h, so it rides in the slack of
        # the serial chain and removes the GX HBM round trip entirely.
        gx = jnp.dot(x_ref[t], wih, preferred_element_type=jnp.float32) + bias
        # Single fused MXU push for all three hidden gates (r | z | n).
        # TODO(synk): on v5e/v6e, pltpu.matmul_push_rhs/acc_lhs could keep W_hh
        # staged in the MXU across the whole time block instead of re-pushing it.
        gh = jnp.dot(h.astype(whh.dtype), whh, preferred_element_type=jnp.float32)
        # sigmoid(x) = 0.5 * (1 + tanh(x/2)): one EUP op for BOTH r and z instead
        # of exp + divide each -> shorter per-step latency on the serial chain.
        rz = 0.5 * (1.0 + jnp.tanh(0.5 * (gx[:, :2 * hp] + gh[:, :2 * hp])))
        r = rz[:, :hp]
        z = rz[:, hp:]
        n = jnp.tanh(gx[:, 2 * hp:] + r * (gh[:, 2 * hp:] + bhn))
        h_cand = (1.0 - z) * n + z * h                         # PyTorch GRUCell
        m = (lens > t_global).astype(jnp.float32)              # (TB, 1)
        h = m * h_cand + (1.0 - m) * h                         # hold h past length
        hall_ref[t] = (m * h_cand).astype(hall_ref.dtype)      # 0 past the length

    h_scr[...] = h

    @pl.when(q == pl.num_programs(1) - 1)
    def _():
        # zero-length sequences are dropped by sortSequence and re-inserted as
        # zeros by revertSequence -> their h_n row must be 0.
        nz = (lens > 0).astype(jnp.float32)
        hn_ref[...] = (h * nz).astype(hn_ref.dtype)


@functools.partial(jax.jit,
                   static_argnames=("tq", "tb", "mxu_dtype", "return_padded"))
def my_gru_forward(x, length, h_init_param, w_ih, w_hh, b_ih, b_hh, *,
                   tq=8, tb=None, mxu_dtype=jnp.float32, return_padded=False):
    """JAX/Pallas equivalent of MyGRU.forward(incoming, length, need_h=True).

    x            : (S, B, I) float32
    length       : (B,)      int32
    h_init_param : (1, 1, H) float32   (MyGRU.h_init for layers=1, unidirectional)
    w_ih         : (3H, I), w_hh: (3H, H), b_ih/b_hh: (3H,)  -- gate order (r, z, n)
    mxu_dtype    : jnp.float32 (bit-faithful) or jnp.bfloat16 (production: halves
                   streamed DMA + faster MXU; elementwise math stays f32)
    Returns (h, h_n) with h: (S, B, H), h_n: (B, H).
    """
    S, B, I = x.shape
    H = h_init_param.shape[-1]
    f32 = jnp.float32
    mxu_dtype = np.dtype(mxu_dtype)
    out_dtype = f32 if mxu_dtype == np.dtype(np.float32) else jnp.bfloat16

    Hp = _round_up(H, 128)        # lane-pad each gate block
    Bp = _round_up(B, 8)          # sublane-pad the batch
    Sp = _round_up(S, tq)         # time padded to a multiple of the time block
    Ip = _round_up(I, 8)          # sublane-pad the input-feature dim
    if tb is None:
        tb = _pick_batch_block(Bp)
    assert Bp % tb == 0 and tb % 8 == 0

    w_ih = w_ih.astype(f32)
    w_hh = w_hh.astype(f32)
    b_ih = b_ih.astype(f32)
    b_hh = b_hh.astype(f32)

    def pad_gate_cols(w):
        # (rows, 3H) -> (rows, 3*Hp): each gate block zero-padded to Hp lanes.
        # The zero padding is load-bearing (keeps padded hidden lanes exactly 0).
        parts = [jnp.pad(w[:, g * H:(g + 1) * H], ((0, 0), (0, Hp - H)))
                 for g in range(3)]
        return jnp.concatenate(parts, axis=1)

    wih_t = jnp.pad(pad_gate_cols(w_ih.T), ((0, Ip - I), (0, 0)))    # (Ip, 3*Hp)
    whh_t = jnp.pad(pad_gate_cols(w_hh.T), ((0, Hp - H), (0, 0)))    # (Hp, 3*Hp)

    # fold b_ih and the r/z parts of b_hh into one additive bias on GX; the
    # n-gate b_hh must stay inside r * (...) and is passed separately.
    b_fold = b_ih + jnp.concatenate([b_hh[:2 * H], jnp.zeros((H,), f32)])
    b_fold = pad_gate_cols(b_fold.reshape(1, 3 * H))                 # (1, 3*Hp)
    bhn = jnp.pad(b_hh[2 * H:].reshape(1, H), ((0, 0), (0, Hp - H)))  # (1, Hp)

    # streamed / MXU operands optionally in bf16; biases, h0/h carry and all
    # elementwise math stay f32 (v5e has no bf16 VPU/EUP).
    x_pad = jnp.pad(x.astype(f32), ((0, Sp - S), (0, Bp - B), (0, Ip - I)))
    x_pad = x_pad.astype(mxu_dtype)
    wih_t = wih_t.astype(mxu_dtype)
    whh_t = whh_t.astype(mxu_dtype)

    h0 = jnp.broadcast_to(h_init_param.reshape(1, H), (B, H)).astype(f32)
    h0 = jnp.pad(h0, ((0, Bp - B), (0, Hp - H)))                     # (Bp, Hp)
    len_pad = jnp.pad(length.astype(jnp.int32), (0, Bp - B)).reshape(Bp, 1)

    kernel = functools.partial(_gru_recurrence_kernel, tq=tq, hp=Hp)

    grid = (Bp // tb, Sp // tq)   # (parallel batch blocks, serial time blocks)

    grid_spec = pltpu.PrefetchScalarGridSpec(
        num_scalar_prefetch=0,
        grid=grid,
        in_specs=[
            pl.BlockSpec((tq, tb, Ip), lambda b, q: (q, b, 0)),      # x time/batch block
            pl.BlockSpec((tb, 1), lambda b, q: (b, 0)),              # lengths (no per-step mask DMA)
            pl.BlockSpec((tb, Hp), lambda b, q: (b, 0)),             # h0
            pl.BlockSpec((Ip, 3 * Hp), lambda b, q: (0, 0)),         # W_ih (fused gates, resident)
            pl.BlockSpec((1, 3 * Hp), lambda b, q: (0, 0)),          # folded input bias
            pl.BlockSpec((Hp, 3 * Hp), lambda b, q: (0, 0)),         # W_hh (fused gates, resident)
            pl.BlockSpec((1, Hp), lambda b, q: (0, 0)),              # b_hh (n gate only)
        ],
        out_specs=[
            pl.BlockSpec((tq, tb, Hp), lambda b, q: (q, b, 0)),      # h per-step, lane-dense
            pl.BlockSpec((tb, Hp), lambda b, q: (b, 0)),             # h_n (resident over q)
        ],
        scratch_shapes=[pltpu.VMEM((tb, Hp), f32)],                  # hidden-state carry
    )

    # Rough per-core VMEM budget: double-buffered streamed blocks (x, h_all) +
    # double-buffered constants + carry.  Only raise the scoped limit if needed.
    mxu_b = mxu_dtype.itemsize
    out_b = np.dtype(out_dtype).itemsize
    est = (2 * tq * tb * Ip * mxu_b + 2 * tq * tb * Hp * out_b
           + 2 * (tb * 4 + tb * Hp * 4 + Ip * 3 * Hp * mxu_b + 3 * Hp * 4
                  + Hp * 3 * Hp * mxu_b + Hp * 4)
           + tb * Hp * 4)
    vmem_limit = None if est < (12 << 20) else min(int(est * 1.25) + (2 << 20), 64 << 20)
    # TODO(synk): on v7x (64 MiB physical VMEM) pick tq/tb so `est` stays <~24 MiB;
    # constant-index inputs could additionally be single-buffered (pl.Buffered(1)).

    h_all, h_n = pl.pallas_call(
        kernel,
        out_shape=(
            jax.ShapeDtypeStruct((Sp, Bp, Hp), out_dtype),
            jax.ShapeDtypeStruct((Bp, Hp), f32),
        ),
        grid_spec=grid_spec,
        compiler_params=pltpu.CompilerParams(
            # batch blocks are independent (sharded across v7x's 2 TensorCores);
            # the time recurrence is serial.
            dimension_semantics=("parallel", "arbitrary"),
            vmem_limit_bytes=vmem_limit,
        ),
    )(x_pad, len_pad, h0, wih_t, b_fold, whh_t, bhn)

    if return_padded or (S == Sp and B == Bp and H == Hp):
        return h_all, h_n          # skip the extra HBM pass of the XLA slice
    return h_all[:S, :B, :H], h_n[:B, :H]


def _reference_gru(x, length, h_init_param, w_ih, w_hh, b_ih, b_hh):
    """Pure-JAX reference with identical pack/pad semantics."""
    S, B, I = x.shape
    H = h_init_param.shape[-1]
    h0 = jnp.broadcast_to(h_init_param[0], (B, H)).astype(jnp.float32)
    mask = (jnp.arange(S)[:, None] < length[None, :]).astype(jnp.float32)[..., None]

    def step(h, inp):
        xt, mt = inp
        gx = xt @ w_ih.T + b_ih
        gh = h @ w_hh.T + b_hh
        r = jax.nn.sigmoid(gx[:, :H] + gh[:, :H])
        z = jax.nn.sigmoid(gx[:, H:2 * H] + gh[:, H:2 * H])
        n = jnp.tanh(gx[:, 2 * H:] + r * gh[:, 2 * H:])
        h_cand = (1 - z) * n + z * h
        h_new = mt * h_cand + (1 - mt) * h
        return h_new, mt * h_cand

    h_final, hs = jax.lax.scan(step, h0, (x, mask))
    h_n = h_final * (length > 0).astype(jnp.float32)[:, None]
    return hs, h_n


if __name__ == "__main__":
    # small shapes consistent with MyGRU(input_size, hidden_size)
    S, B, I, H = 8, 8, 16, 32

    key = jax.random.PRNGKey(0)
    k_x, k_wi, k_wh, k_bi, k_bh, k_h0 = jax.random.split(key, 6)

    stdv = 1.0 / math.sqrt(H)   # PyTorch GRU + MyGRU.reset_parameters init scale
    x = jax.random.normal(k_x, (S, B, I), dtype=jnp.float32)
    w_ih = jax.random.uniform(k_wi, (3 * H, I), minval=-stdv, maxval=stdv, dtype=jnp.float32)
    w_hh = jax.random.uniform(k_wh, (3 * H, H), minval=-stdv, maxval=stdv, dtype=jnp.float32)
    b_ih = jax.random.uniform(k_bi, (3 * H,), minval=-stdv, maxval=stdv, dtype=jnp.float32)
    b_hh = jax.random.uniform(k_bh, (3 * H,), minval=-stdv, maxval=stdv, dtype=jnp.float32)
    h_init = jax.random.uniform(k_h0, (1, 1, H), minval=-stdv, maxval=stdv, dtype=jnp.float32)

    # variable lengths, including a zero-length sequence
    length = jnp.array([8, 5, 3, 0, 8, 1, 7, 2], dtype=jnp.int32)

    # f32 path: bit-faithful check against the pure-JAX reference
    h, h_n = my_gru_forward(x, length, h_init, w_ih, w_hh, b_ih, b_hh)
    jax.block_until_ready((h, h_n))

    h_ref, h_n_ref = _reference_gru(x, length, h_init, w_ih, w_hh, b_ih, b_hh)
    np.testing.assert_allclose(np.asarray(h), np.asarray(h_ref), rtol=1e-5, atol=1e-5)
    np.testing.assert_allclose(np.asarray(h_n), np.asarray(h_n_ref), rtol=1e-5, atol=1e-5)

    # bf16 MXU-operand / streamed-DMA variant (production option): sanity check only.
    h_bf, h_n_bf = my_gru_forward(x, length, h_init, w_ih, w_hh, b_ih, b_hh,
                                  mxu_dtype=jnp.bfloat16)
    jax.block_until_ready((h_bf, h_n_bf))
    np.testing.assert_allclose(np.asarray(h_bf.astype(jnp.float32)), np.asarray(h_ref),
                               rtol=0.1, atol=0.1)
    np.testing.assert_allclose(np.asarray(h_n_bf), np.asarray(h_n_ref),
                               rtol=0.1, atol=0.1)

    print("KERNEL_OK")
</pallas_src>

<mosaic_0001>
module attributes {stable_mosaic.version = 11 : i64} {
  func.func @_gru_recurrence_kernel(%arg0: i32, %arg1: i32, %arg2: memref<8x8x16xf32, #tpu.memory_space<vmem>>, %arg3: memref<8x1xi32, #tpu.memory_space<vmem>>, %arg4: memref<8x128xf32, #tpu.memory_space<vmem>>, %arg5: memref<16x384xf32, #tpu.memory_space<vmem>>, %arg6: memref<1x384xf32, #tpu.memory_space<vmem>>, %arg7: memref<128x384xf32, #tpu.memory_space<vmem>>, %arg8: memref<1x128xf32, #tpu.memory_space<vmem>>, %arg9: memref<8x8x128xf32, #tpu.memory_space<vmem>>, %arg10: memref<8x128xf32, #tpu.memory_space<vmem>>, %arg11: memref<8x128xf32, #tpu.memory_space<vmem>>) attributes {dimension_semantics = [#tpu.dimension_semantics<parallel>, #tpu.dimension_semantics<arbitrary>], iteration_bounds = array<i64: 1, 1>, scalar_prefetch = 0 : i64, scratch_operands = 1 : i64, tpu.core_type = #tpu.core_type<tc>, window_params = [{transform_indices = @transform_0, window_bounds = array<i64: 8, 8, 16>}, {transform_indices = @transform_1, window_bounds = array<i64: 8, 1>}, {transform_indices = @transform_2, window_bounds = array<i64: 8, 128>}, {pipeline_mode = #tpu.pipeline_mode<synchronous>, transform_indices = @transform_3, window_bounds = array<i64: 16, 384>}, {pipeline_mode = #tpu.pipeline_mode<synchronous>, transform_indices = @transform_4, window_bounds = array<i64: 1, 384>}, {pipeline_mode = #tpu.pipeline_mode<synchronous>, transform_indices = @transform_5, window_bounds = array<i64: 128, 384>}, {pipeline_mode = #tpu.pipeline_mode<synchronous>, transform_indices = @transform_6, window_bounds = array<i64: 1, 128>}, {transform_indices = @transform_7, window_bounds = array<i64: 8, 8, 128>}, {transform_indices = @transform_8, window_bounds = array<i64: 8, 128>}]} {
    %c0_i32 = arith.constant 0 : i32
    %0 = arith.cmpi eq, %arg1, %c0_i32 : i32
    %1 = arith.extui %0 : i1 to i32
    %c0_i32_0 = arith.constant 0 : i32
    %2 = arith.cmpi ne, %1, %c0_i32_0 : i32
    scf.if %2 {
      %c0_120 = arith.constant 0 : index
      %c0_121 = arith.constant 0 : index
      %385 = vector.load %arg4[%c0_120, %c0_121] : memref<8x128xf32, #tpu.memory_space<vmem>>, vector<8x128xf32>
      %c0_122 = arith.constant 0 : index
      %c0_123 = arith.constant 0 : index
      %386 = vector.load %arg11[%c0_122, %c0_123] : memref<8x128xf32, #tpu.memory_space<vmem>>, vector<8x128xf32>
      tpu.vector_store %arg11[%c0_122, %c0_123], %385 {strides = array<i32>} : memref<8x128xf32, #tpu.memory_space<vmem>>, vector<8x128xf32>,
    } else {
    }
    %c0 = arith.constant 0 : index
    %c0_1 = arith.constant 0 : index
    %3 = vector.load %arg3[%c0, %c0_1] : memref<8x1xi32, #tpu.memory_space<vmem>>, vector<8x1xi32>
    %c0_2 = arith.constant 0 : index
    %c0_3 = arith.constant 0 : index
    %4 = vector.load %arg5[%c0_2, %c0_3] : memref<16x384xf32, #tpu.memory_space<vmem>>, vector<16x384xf32>
    %c0_4 = arith.constant 0 : index
    %c0_5 = arith.constant 0 : index
    %5 = vector.load %arg7[%c0_4, %c0_5] : memref<128x384xf32, #tpu.memory_space<vmem>>, vector<128x384xf32>
    %c0_6 = arith.constant 0 : index
    %c0_7 = arith.constant 0 : index
    %6 = vector.load %arg6[%c0_6, %c0_7] : memref<1x384xf32, #tpu.memory_space<vmem>>, vector<1x384xf32>
    %7 = vector.shape_cast %6 : vector<1x384xf32> to vector<1x384xf32>
    %8 = vector.broadcast %7 : vector<1x384xf32> to vector<8x384xf32>
    %c0_8 = arith.constant 0 : index
    %c0_9 = arith.constant 0 : index
    %9 = vector.load %arg8[%c0_8, %c0_9] : memref<1x128xf32, #tpu.memory_space<vmem>>, vector<1x128xf32>
    %10 = vector.shape_cast %9 : vector<1x128xf32> to vector<1x128xf32>
    %11 = vector.broadcast %10 : vector<1x128xf32> to vector<8x128xf32>
    %c0_10 = arith.constant 0 : index
    %c0_11 = arith.constant 0 : index
    %12 = vector.load %arg11[%c0_10, %c0_11] : memref<8x128xf32, #tpu.memory_space<vmem>>, vector<8x128xf32>
    %c8_i32 = arith.constant 8 : i32
    %13 = arith.muli %arg1, %c8_i32 : i32
    %c0_i32_12 = arith.constant 0 : i32
    %14 = arith.addi %13, %c0_i32_12 : i32
    %c0_13 = arith.constant 0 : index
    %c0_14 = arith.constant 0 : index
    %c0_15 = arith.constant 0 : index
    %15 = vector.load %arg2[%c0_13, %c0_14, %c0_15] : memref<8x8x16xf32, #tpu.memory_space<vmem>>, vector<1x8x16xf32>
    %16 = vector.shape_cast %15 : vector<1x8x16xf32> to vector<8x16xf32>
    %cst = arith.constant dense<0.000000e+00> : vector<8x384xf32>
    %17 = tpu.matmul %16, %4, %cst {dimension_numbers = #tpu.dot_dimension_numbers<[1], [0], [0], [1], [0, 0, 1, 1], [], []>} : vector<8x16xf32>, vector<16x384xf32>, vector<8x384xf32> -> vector<8x384xf32>
    %18 = arith.addf %17, %8 : vector<8x384xf32>
    %cst_16 = arith.constant dense<0.000000e+00> : vector<8x384xf32>
    %19 = tpu.matmul %12, %5, %cst_16 {dimension_numbers = #tpu.dot_dimension_numbers<[1], [0], [0], [1], [0, 0, 1, 1], [], []>} : vector<8x128xf32>, vector<128x384xf32>, vector<8x384xf32> -> vector<8x384xf32>
    %20 = vector.extract_strided_slice %18 {offsets = [0, 0], sizes = [8, 256], strides = [1, 1]} : vector<8x384xf32> to vector<8x256xf32>
    %21 = vector.extract_strided_slice %19 {offsets = [0, 0], sizes = [8, 256], strides = [1, 1]} : vector<8x384xf32> to vector<8x256xf32>
    %22 = arith.addf %20, %21 : vector<8x256xf32>
    %cst_17 = arith.constant 5.000000e-01 : f32
    %23 = vector.broadcast %cst_17 : f32 to vector<8x256xf32>
    %24 = arith.mulf %23, %22 : vector<8x256xf32>
    %25 = math.tanh %24 : vector<8x256xf32>
    %cst_18 = arith.constant 1.000000e+00 : f32
    %26 = vector.broadcast %cst_18 : f32 to vector<8x256xf32>
    %27 = arith.addf %26, %25 : vector<8x256xf32>
    %cst_19 = arith.constant 5.000000e-01 : f32
    %28 = vector.broadcast %cst_19 : f32 to vector<8x256xf32>
    %29 = arith.mulf %28, %27 : vector<8x256xf32>
    %30 = vector.extract_strided_slice %29 {offsets = [0, 0], sizes = [8, 128], strides = [1, 1]} : vector<8x256xf32> to vector<8x128xf32>
    %31 = vector.extract_strided_slice %29 {offsets = [0, 128], sizes = [8, 128], strides = [1, 1]} : vector<8x256xf32> to vector<8x128xf32>
    %32 = vector.extract_strided_slice %18 {offsets = [0, 256], sizes = [8, 128], strides = [1, 1]} : vector<8x384xf32> to vector<8x128xf32>
    %33 = vector.extract_strided_slice %19 {offsets = [0, 256], sizes = [8, 128], strides = [1, 1]} : vector<8x384xf32> to vector<8x128xf32>
    %34 = arith.addf %33, %11 : vector<8x128xf32>
    %35 = arith.mulf %30, %34 : vector<8x128xf32>
    %36 = arith.addf %32, %35 : vector<8x128xf32>
    %37 = math.tanh %36 : vector<8x128xf32>
    %cst_20 = arith.constant 1.000000e+00 : f32
    %38 = vector.broadcast %cst_20 : f32 to vector<8x128xf32>
    %39 = arith.subf %38, %31 : vector<8x128xf32>
    %40 = arith.mulf %39, %37 : vector<8x128xf32>
    %41 = arith.mulf %31, %12 : vector<8x128xf32>
    %42 = arith.addf %40, %41 : vector<8x128xf32>
    %43 = vector.broadcast %14 : i32 to vector<8x1xi32>
    %44 = arith.cmpi sgt, %3, %43 : vector<8x1xi32>
    %45 = arith.extui %44 : vector<8x1xi1> to vector<8x1xi32>
    %46 = arith.sitofp %45 : vector<8x1xi32> to vector<8x1xf32>
    %47 = vector.broadcast %46 : vector<8x1xf32> to vector<8x128xf32>
    %48 = arith.mulf %47, %42 : vector<8x128xf32>
    %cst_21 = arith.constant 1.000000e+00 : f32
    %49 = vector.broadcast %cst_21 : f32 to vector<8x1xf32>
    %50 = arith.subf %49, %46 : vector<8x1xf32>
    %51 = vector.broadcast %50 : vector<8x1xf32> to vector<8x128xf32>
    %52 = arith.mulf %51, %12 : vector<8x128xf32>
    %53 = arith.addf %48, %52 : vector<8x128xf32>
    %54 = vector.broadcast %46 : vector<8x1xf32> to vector<8x128xf32>
    %55 = arith.mulf %54, %42 : vector<8x128xf32>
    %c0_22 = arith.constant 0 : index
    %c0_23 = arith.constant 0 : index
    %c0_24 = arith.constant 0 : index
    %56 = vector.load %arg9[%c0_22, %c0_23, %c0_24] : memref<8x8x128xf32, #tpu.memory_space<vmem>>, vector<1x8x128xf32>
    %57 = vector.shape_cast %56 : vector<1x8x128xf32> to vector<8x128xf32>
    %58 = vector.shape_cast %55 : vector<8x128xf32> to vector<1x8x128xf32>
    tpu.vector_store %arg9[%c0_22, %c0_23, %c0_24], %58 {strides = array<i32>} : memref<8x8x128xf32, #tpu.memory_space<vmem>>, vector<1x8x128xf32>,
    %c8_i32_25 = arith.constant 8 : i32
    %59 = arith.muli %arg1, %c8_i32_25 : i32
    %c1_i32 = arith.constant 1 : i32
    %60 = arith.addi %59, %c1_i32 : i32
    %c1 = arith.constant 1 : index
    %c0_26 = arith.constant 0 : index
    %c0_27 = arith.constant 0 : index
    %61 = vector.load %arg2[%c1, %c0_26, %c0_27] : memref<8x8x16xf32, #tpu.memory_space<vmem>>, vector<1x8x16xf32>
    %62 = vector.shape_cast %61 : vector<1x8x16xf32> to vector<8x16xf32>
    %cst_28 = arith.constant dense<0.000000e+00> : vector<8x384xf32>
    %63 = tpu.matmul %62, %4, %cst_28 {dimension_numbers = #tpu.dot_dimension_numbers<[1], [0], [0], [1], [0, 0, 1, 1], [], []>} : vector<8x16xf32>, vector<16x384xf32>, vector<8x384xf32> -> vector<8x384xf32>
    %64 = arith.addf %63, %8 : vector<8x384xf32>
    %cst_29 = arith.constant dense<0.000000e+00> : vector<8x384xf32>
    %65 = tpu.matmul %53, %5, %cst_29 {dimension_numbers = #tpu.dot_dimension_numbers<[1], [0], [0], [1], [0, 0, 1, 1], [], []>} : vector<8x128xf32>, vector<128x384xf32>, vector<8x384xf32> -> vector<8x384xf32>
    %66 = vector.extract_strided_slice %64 {offsets = [0, 0], sizes = [8, 256], strides = [1, 1]} : vector<8x384xf32> to vector<8x256xf32>
    %67 = vector.extract_strided_slice %65 {offsets = [0, 0], sizes = [8, 256], strides = [1, 1]} : vector<8x384xf32> to vector<8x256xf32>
    %68 = arith.addf %66, %67 : vector<8x256xf32>
    %cst_30 = arith.constant 5.000000e-01 : f32
    %69 = vector.broadcast %cst_30 : f32 to vector<8x256xf32>
    %70 = arith.mulf %69, %68 : vector<8x256xf32>
    %71 = math.tanh %70 : vector<8x256xf32>
    %cst_31 = arith.constant 1.000000e+00 : f32
    %72 = vector.broadcast %cst_31 : f32 to vector<8x256xf32>
    %73 = arith.addf %72, %71 : vector<8x256xf32>
    %cst_32 = arith.constant 5.000000e-01 : f32
    %74 = vector.broadcast %cst_32 : f32 to vector<8x256xf32>
    %75 = arith.mulf %74, %73 : vector<8x256xf32>
    %76 = vector.extract_strided_slice %75 {offsets = [0, 0], sizes = [8, 128], strides = [1, 1]} : vector<8x256xf32> to vector<8x128xf32>
    %77 = vector.extract_strided_slice %75 {offsets = [0, 128], sizes = [8, 128], strides = [1, 1]} : vector<8x256xf32> to vector<8x128xf32>
    %78 = vector.extract_strided_slice %64 {offsets = [0, 256], sizes = [8, 128], strides = [1, 1]} : vector<8x384xf32> to vector<8x128xf32>
    %79 = vector.extract_strided_slice %65 {offsets = [0, 256], sizes = [8, 128], strides = [1, 1]} : vector<8x384xf32> to vector<8x128xf32>
    %80 = arith.addf %79, %11 : vector<8x128xf32>
    %81 = arith.mulf %76, %80 : vector<8x128xf32>
    %82 = arith.addf %78, %81 : vector<8x128xf32>
    %83 = math.tanh %82 : vector<8x128xf32>
    %cst_33 = arith.constant 1.000000e+00 : f32
    %84 = vector.broadcast %cst_33 : f32 to vector<8x128xf32>
    %85 = arith.subf %84, %77 : vector<8x128xf32>
    %86 = arith.mulf %85, %83 : vector<8x128xf32>
    %87 = arith.mulf %77, %53 : vector<8x128xf32>
    %88 = arith.addf %86, %87 : vector<8x128xf32>
    %89 = vector.broadcast %60 : i32 to vector<8x1xi32>
    %90 = arith.cmpi sgt, %3, %89 : vector<8x1xi32>
    %91 = arith.extui %90 : vector<8x1xi1> to vector<8x1xi32>
    %92 = arith.sitofp %91 : vector<8x1xi32> to vector<8x1xf32>
    %93 = vector.broadcast %92 : vector<8x1xf32> to vector<8x128xf32>
    %94 = arith.mulf %93, %88 : vector<8x128xf32>
    %cst_34 = arith.constant 1.000000e+00 : f32
    %95 = vector.broadcast %cst_34 : f32 to vector<8x1xf32>
    %96 = arith.subf %95, %92 : vector<8x1xf32>
    %97 = vector.broadcast %96 : vector<8x1xf32> to vector<8x128xf32>
    %98 = arith.mulf %97, %53 : vector<8x128xf32>
    %99 = arith.addf %94, %98 : vector<8x128xf32>
    %100 = vector.broadcast %92 : vector<8x1xf32> to vector<8x128xf32>
    %101 = arith.mulf %100, %88 : vector<8x128xf32>
    %c1_35 = arith.constant 1 : index
    %c0_36 = arith.constant 0 : index
    %c0_37 = arith.constant 0 : index
    %102 = vector.load %arg9[%c1_35, %c0_36, %c0_37] : memref<8x8x128xf32, #tpu.memory_space<vmem>>, vector<1x8x128xf32>
    %103 = vector.shape_cast %102 : vector<1x8x128xf32> to vector<8x128xf32>
    %104 = vector.shape_cast %101 : vector<8x128xf32> to vector<1x8x128xf32>
    tpu.vector_store %arg9[%c1_35, %c0_36, %c0_37], %104 {strides = array<i32>} : memref<8x8x128xf32, #tpu.memory_space<vmem>>, vector<1x8x128xf32>,
    %c8_i32_38 = arith.constant 8 : i32
    %105 = arith.muli %arg1, %c8_i32_38 : i32
    %c2_i32 = arith.constant 2 : i32
    %106 = arith.addi %105, %c2_i32 : i32
    %c2 = arith.constant 2 : index
    %c0_39 = arith.constant 0 : index
    %c0_40 = arith.constant 0 : index
    %107 = vector.load %arg2[%c2, %c0_39, %c0_40] : memref<8x8x16xf32, #tpu.memory_space<vmem>>, vector<1x8x16xf32>
    %108 = vector.shape_cast %107 : vector<1x8x16xf32> to vector<8x16xf32>
    %cst_41 = arith.constant dense<0.000000e+00> : vector<8x384xf32>
    %109 = tpu.matmul %108, %4, %cst_41 {dimension_numbers = #tpu.dot_dimension_numbers<[1], [0], [0], [1], [0, 0, 1, 1], [], []>} : vector<8x16xf32>, vector<16x384xf32>, vector<8x384xf32> -> vector<8x384xf32>
    %110 = arith.addf %109, %8 : vector<8x384xf32>
    %cst_42 = arith.constant dense<0.000000e+00> : vector<8x384xf32>
    %111 = tpu.matmul %99, %5, %cst_42 {dimension_numbers = #tpu.dot_dimension_numbers<[1], [0], [0], [1], [0, 0, 1, 1], [], []>} : vector<8x128xf32>, vector<128x384xf32>, vector<8x384xf32> -> vector<8x384xf32>
    %112 = vector.extract_strided_slice %110 {offsets = [0, 0], sizes = [8, 256], strides = [1, 1]} : vector<8x384xf32> to vector<8x256xf32>
    %113 = vector.extract_strided_slice %111 {offsets = [0, 0], sizes = [8, 256], strides = [1, 1]} : vector<8x384xf32> to vector<8x256xf32>
    %114 = arith.addf %112, %113 : vector<8x256xf32>
    %cst_43 = arith.constant 5.000000e-01 : f32
    %115 = vector.broadcast %cst_43 : f32 to vector<8x256xf32>
    %116 = arith.mulf %115, %114 : vector<8x256xf32>
    %117 = math.tanh %116 : vector<8x256xf32>
    %cst_44 = arith.constant 1.000000e+00 : f32
    %118 = vector.broadcast %cst_44 : f32 to vector<8x256xf32>
    %119 = arith.addf %118, %117 : vector<8x256xf32>
    %cst_45 = arith.constant 5.000000e-01 : f32
    %120 = vector.broadcast %cst_45 : f32 to vector<8x256xf32>
    %121 = arith.mulf %120, %119 : vector<8x256xf32>
    %122 = vector.extract_strided_slice %121 {offsets = [0, 0], sizes = [8, 128], strides = [1, 1]} : vector<8x256xf32> to vector<8x128xf32>
    %123 = vector.extract_strided_slice %121 {offsets = [0, 128], sizes = [8, 128], strides = [1, 1]} : vector<8x256xf32> to vector<8x128xf32>
    %124 = vector.extract_strided_slice %110 {offsets = [0, 256], sizes = [8, 128], strides = [1, 1]} : vector<8x384xf32> to vector<8x128xf32>
    %125 = vector.extract_strided_slice %111 {offsets = [0, 256], sizes = [8, 128], strides = [1, 1]} : vector<8x384xf32> to vector<8x128xf32>
    %126 = arith.addf %125, %11 : vector<8x128xf32>
    %127 = arith.mulf %122, %126 : vector<8x128xf32>
    %128 = arith.addf %124, %127 : vector<8x128xf32>
    %129 = math.tanh %128 : vector<8x128xf32>
    %cst_46 = arith.constant 1.000000e+00 : f32
    %130 = vector.broadcast %cst_46 : f32 to vector<8x128xf32>
    %131 = arith.subf %130, %123 : vector<8x128xf32>
    %132 = arith.mulf %131, %129 : vector<8x128xf32>
    %133 = arith.mulf %123, %99 : vector<8x128xf32>
    %134 = arith.addf %132, %133 : vector<8x128xf32>
    %135 = vector.broadcast %106 : i32 to vector<8x1xi32>
    %136 = arith.cmpi sgt, %3, %135 : vector<8x1xi32>
    %137 = arith.extui %136 : vector<8x1xi1> to vector<8x1xi32>
    %138 = arith.sitofp %137 : vector<8x1xi32> to vector<8x1xf32>
    %139 = vector.broadcast %138 : vector<8x1xf32> to vector<8x128xf32>
    %140 = arith.mulf %139, %134 : vector<8x128xf32>
    %cst_47 = arith.constant 1.000000e+00 : f32
    %141 = vector.broadcast %cst_47 : f32 to vector<8x1xf32>
    %142 = arith.subf %141, %138 : vector<8x1xf32>
    %143 = vector.broadcast %142 : vector<8x1xf32> to vector<8x128xf32>
    %144 = arith.mulf %143, %99 : vector<8x128xf32>
    %145 = arith.addf %140, %144 : vector<8x128xf32>
    %146 = vector.broadcast %138 : vector<8x1xf32> to vector<8x128xf32>
    %147 = arith.mulf %146, %134 : vector<8x128xf32>
    %c2_48 = arith.constant 2 : index
    %c0_49 = arith.constant 0 : index
    %c0_50 = arith.constant 0 : index
    %148 = vector.load %arg9[%c2_48, %c0_49, %c0_50] : memref<8x8x128xf32, #tpu.memory_space<vmem>>, vector<1x8x128xf32>
    %149 = vector.shape_cast %148 : vector<1x8x128xf32> to vector<8x128xf32>
    %150 = vector.shape_cast %147 : vector<8x128xf32> to vector<1x8x128xf32>
    tpu.vector_store %arg9[%c2_48, %c0_49, %c0_50], %150 {strides = array<i32>} : memref<8x8x128xf32, #tpu.memory_space<vmem>>, vector<1x8x128xf32>,
    %c8_i32_51 = arith.constant 8 : i32
    %151 = arith.muli %arg1, %c8_i32_51 : i32
    %c3_i32 = arith.constant 3 : i32
    %152 = arith.addi %151, %c3_i32 : i32
    %c3 = arith.constant 3 : index
    %c0_52 = arith.constant 0 : index
    %c0_53 = arith.constant 0 : index
    %153 = vector.load %arg2[%c3, %c0_52, %c0_53] : memref<8x8x16xf32, #tpu.memory_space<vmem>>, vector<1x8x16xf32>
    %154 = vector.shape_cast %153 : vector<1x8x16xf32> to vector<8x16xf32>
    %cst_54 = arith.constant dense<0.000000e+00> : vector<8x384xf32>
    %155 = tpu.matmul %154, %4, %cst_54 {dimension_numbers = #tpu.dot_dimension_numbers<[1], [0], [0], [1], [0, 0, 1, 1], [], []>} : vector<8x16xf32>, vector<16x384xf32>, vector<8x384xf32> -> vector<8x384xf32>
    %156 = arith.addf %155, %8 : vector<8x384xf32>
    %cst_55 = arith.constant dense<0.000000e+00> : vector<8x384xf32>
    %157 = tpu.matmul %145, %5, %cst_55 {dimension_numbers = #tpu.dot_dimension_numbers<[1], [0], [0], [1], [0, 0, 1, 1], [], []>} : vector<8x128xf32>, vector<128x384xf32>, vector<8x384xf32> -> vector<8x384xf32>
    %158 = vector.extract_strided_slice %156 {offsets = [0, 0], sizes = [8, 256], strides = [1, 1]} : vector<8x384xf32> to vector<8x256xf32>
    %159 = vector.extract_strided_slice %157 {offsets = [0, 0], sizes = [8, 256], strides = [1, 1]} : vector<8x384xf32> to vector<8x256xf32>
    %160 = arith.addf %158, %159 : vector<8x256xf32>
    %cst_56 = arith.constant 5.000000e-01 : f32
    %161 = vector.broadcast %cst_56 : f32 to vector<8x256xf32>
    %162 = arith.mulf %161, %160 : vector<8x256xf32>
    %163 = math.tanh %162 : vector<8x256xf32>
    %cst_57 = arith.constant 1.000000e+00 : f32
    %164 = vector.broadcast %cst_57 : f32 to vector<8x256xf32>
    %165 = arith.addf %164, %163 : vector<8x256xf32>
    %cst_58 = arith.constant 5.000000e-01 : f32
    %166 = vector.broadcast %cst_58 : f32 to vector<8x256xf32>
    %167 = arith.mulf %166, %165 : vector<8x256xf32>
    %168 = vector.extract_strided_slice %167 {offsets = [0, 0], sizes = [8, 128], strides = [1, 1]} : vector<8x256xf32> to vector<8x128xf32>
    %169 = vector.extract_strided_slice %167 {offsets = [0, 128], sizes = [8, 128], strides = [1, 1]} : vector<8x256xf32> to vector<8x128xf32>
    %170 = vector.extract_strided_slice %156 {offsets = [0, 256], sizes = [8, 128], strides = [1, 1]} : vector<8x384xf32> to vector<8x128xf32>
    %171 = vector.extract_strided_slice %157 {offsets = [0, 256], sizes = [8, 128], strides = [1, 1]} : vector<8x384xf32> to vector<8x128xf32>
    %172 = arith.addf %171, %11 : vector<8x128xf32>
    %173 = arith.mulf %168, %172 : vector<8x128xf32>
    %174 = arith.addf %170, %173 : vector<8x128xf32>
    %175 = math.tanh %174 : vector<8x128xf32>
    %cst_59 = arith.constant 1.000000e+00 : f32
    %176 = vector.broadcast %cst_59 : f32 to vector<8x128xf32>
    %177 = arith.subf %176, %169 : vector<8x128xf32>
    %178 = arith.mulf %177, %175 : vector<8x128xf32>
    %179 = arith.mulf %169, %145 : vector<8x128xf32>
    %180 = arith.addf %178, %179 : vector<8x128xf32>
    %181 = vector.broadcast %152 : i32 to vector<8x1xi32>
    %182 = arith.cmpi sgt, %3, %181 : vector<8x1xi32>
    %183 = arith.extui %182 : vector<8x1xi1> to vector<8x1xi32>
    %184 = arith.sitofp %183 : vector<8x1xi32> to vector<8x1xf32>
    %185 = vector.broadcast %184 : vector<8x1xf32> to vector<8x128xf32>
    %186 = arith.mulf %185, %180 : vector<8x128xf32>
    %cst_60 = arith.constant 1.000000e+00 : f32
    %187 = vector.broadcast %cst_60 : f32 to vector<8x1xf32>
    %188 = arith.subf %187, %184 : vector<8x1xf32>
    %189 = vector.broadcast %188 : vector<8x1xf32> to vector<8x128xf32>
    %190 = arith.mulf %189, %145 : vector<8x128xf32>
    %191 = arith.addf %186, %190 : vector<8x128xf32>
    %192 = vector.broadcast %184 : vector<8x1xf32> to vector<8x128xf32>
    %193 = arith.mulf %192, %180 : vector<8x128xf32>
    %c3_61 = arith.constant 3 : index
    %c0_62 = arith.constant 0 : index
    %c0_63 = arith.constant 0 : index
    %194 = vector.load %arg9[%c3_61, %c0_62, %c0_63] : memref<8x8x128xf32, #tpu.memory_space<vmem>>, vector<1x8x128xf32>
    %195 = vector.shape_cast %194 : vector<1x8x128xf32> to vector<8x128xf32>
    %196 = vector.shape_cast %193 : vector<8x128xf32> to vector<1x8x128xf32>
    tpu.vector_store %arg9[%c3_61, %c0_62, %c0_63], %196 {strides = array<i32>} : memref<8x8x128xf32, #tpu.memory_space<vmem>>, vector<1x8x128xf32>,
    %c8_i32_64 = arith.constant 8 : i32
    %197 = arith.muli %arg1, %c8_i32_64 : i32
    %c4_i32 = arith.constant 4 : i32
    %198 = arith.addi %197, %c4_i32 : i32
    %c4 = arith.constant 4 : index
    %c0_65 = arith.constant 0 : index
    %c0_66 = arith.constant 0 : index
    %199 = vector.load %arg2[%c4, %c0_65, %c0_66] : memref<8x8x16xf32, #tpu.memory_space<vmem>>, vector<1x8x16xf32>
    %200 = vector.shape_cast %199 : vector<1x8x16xf32> to vector<8x16xf32>
    %cst_67 = arith.constant dense<0.000000e+00> : vector<8x384xf32>
    %201 = tpu.matmul %200, %4, %cst_67 {dimension_numbers = #tpu.dot_dimension_numbers<[1], [0], [0], [1], [0, 0, 1, 1], [], []>} : vector<8x16xf32>, vector<16x384xf32>, vector<8x384xf32> -> vector<8x384xf32>
    %202 = arith.addf %201, %8 : vector<8x384xf32>
    %cst_68 = arith.constant dense<0.000000e+00> : vector<8x384xf32>
    %203 = tpu.matmul %191, %5, %cst_68 {dimension_numbers = #tpu.dot_dimension_numbers<[1], [0], [0], [1], [0, 0, 1, 1], [], []>} : vector<8x128xf32>, vector<128x384xf32>, vector<8x384xf32> -> vector<8x384xf32>
    %204 = vector.extract_strided_slice %202 {offsets = [0, 0], sizes = [8, 256], strides = [1, 1]} : vector<8x384xf32> to vector<8x256xf32>
    %205 = vector.extract_strided_slice %203 {offsets = [0, 0], sizes = [8, 256], strides = [1, 1]} : vector<8x384xf32> to vector<8x256xf32>
    %206 = arith.addf %204, %205 : vector<8x256xf32>
    %cst_69 = arith.constant 5.000000e-01 : f32
    %207 = vector.broadcast %cst_69 : f32 to vector<8x256xf32>
    %208 = arith.mulf %207, %206 : vector<8x256xf32>
    %209 = math.tanh %208 : vector<8x256xf32>
    %cst_70 = arith.constant 1.000000e+00 : f32
    %210 = vector.broadcast %cst_70 : f32 to vector<8x256xf32>
    %211 = arith.addf %210, %209 : vector<8x256xf32>
    %cst_71 = arith.constant 5.000000e-01 : f32
    %212 = vector.broadcast %cst_71 : f32 to vector<8x256xf32>
    %213 = arith.mulf %212, %211 : vector<8x256xf32>
    %214 = vector.extract_strided_slice %213 {offsets = [0, 0], sizes = [8, 128], strides = [1, 1]} : vector<8x256xf32> to vector<8x128xf32>
    %215 = vector.extract_strided_slice %213 {offsets = [0, 128], sizes = [8, 128], strides = [1, 1]} : vector<8x256xf32> to vector<8x128xf32>
    %216 = vector.extract_strided_slice %202 {offsets = [0, 256], sizes = [8, 128], strides = [1, 1]} : vector<8x384xf32> to vector<8x128xf32>
    %217 = vector.extract_strided_slice %203 {offsets = [0, 256], sizes = [8, 128], strides = [1, 1]} : vector<8x384xf32> to vector<8x128xf32>
    %218 = arith.addf %217, %11 : vector<8x128xf32>
    %219 = arith.mulf %214, %218 : vector<8x128xf32>
    %220 = arith.addf %216, %219 : vector<8x128xf32>
    %221 = math.tanh %220 : vector<8x128xf32>
    %cst_72 = arith.constant 1.000000e+00 : f32
    %222 = vector.broadcast %cst_72 : f32 to vector<8x128xf32>
    %223 = arith.subf %222, %215 : vector<8x128xf32>
    %224 = arith.mulf %223, %221 : vector<8x128xf32>
    %225 = arith.mulf %215, %191 : vector<8x128xf32>
    %226 = arith.addf %224, %225 : vector<8x128xf32>
    %227 = vector.broadcast %198 : i32 to vector<8x1xi32>
    %228 = arith.cmpi sgt, %3, %227 : vector<8x1xi32>
    %229 = arith.extui %228 : vector<8x1xi1> to vector<8x1xi32>
    %230 = arith.sitofp %229 : vector<8x1xi32> to vector<8x1xf32>
    %231 = vector.broadcast %230 : vector<8x1xf32> to vector<8x128xf32>
    %232 = arith.mulf %231, %226 : vector<8x128xf32>
    %cst_73 = arith.constant 1.000000e+00 : f32
    %233 = vector.broadcast %cst_73 : f32 to vector<8x1xf32>
    %234 = arith.subf %233, %230 : vector<8x1xf32>
    %235 = vector.broadcast %234 : vector<8x1xf32> to vector<8x128xf32>
    %236 = arith.mulf %235, %191 : vector<8x128xf32>
    %237 = arith.addf %232, %236 : vector<8x128xf32>
    %238 = vector.broadcast %230 : vector<8x1xf32> to vector<8x128xf32>
    %239 = arith.mulf %238, %226 : vector<8x128xf32>
    %c4_74 = arith.constant 4 : index
    %c0_75 = arith.constant 0 : index
    %c0_76 = arith.constant 0 : index
    %240 = vector.load %arg9[%c4_74, %c0_75, %c0_76] : memref<8x8x128xf32, #tpu.memory_space<vmem>>, vector<1x8x128xf32>
    %241 = vector.shape_cast %240 : vector<1x8x128xf32> to vector<8x128xf32>
    %242 = vector.shape_cast %239 : vector<8x128xf32> to vector<1x8x128xf32>
    tpu.vector_store %arg9[%c4_74, %c0_75, %c0_76], %242 {strides = array<i32>} : memref<8x8x128xf32, #tpu.memory_space<vmem>>, vector<1x8x128xf32>,
    %c8_i32_77 = arith.constant 8 : i32
    %243 = arith.muli %arg1, %c8_i32_77 : i32
    %c5_i32 = arith.constant 5 : i32
    %244 = arith.addi %243, %c5_i32 : i32
    %c5 = arith.constant 5 : index
    %c0_78 = arith.constant 0 : index
    %c0_79 = arith.constant 0 : index
    %245 = vector.load %arg2[%c5, %c0_78, %c0_79] : memref<8x8x16xf32, #tpu.memory_space<vmem>>, vector<1x8x16xf32>
    %246 = vector.shape_cast %245 : vector<1x8x16xf32> to vector<8x16xf32>
    %cst_80 = arith.constant dense<0.000000e+00> : vector<8x384xf32>
    %247 = tpu.matmul %246, %4, %cst_80 {dimension_numbers = #tpu.dot_dimension_numbers<[1], [0], [0], [1], [0, 0, 1, 1], [], []>} : vector<8x16xf32>, vector<16x384xf32>, vector<8x384xf32> -> vector<8x384xf32>
    %248 = arith.addf %247, %8 : vector<8x384xf32>
    %cst_81 = arith.constant dense<0.000000e+00> : vector<8x384xf32>
    %249 = tpu.matmul %237, %5, %cst_81 {dimension_numbers = #tpu.dot_dimension_numbers<[1], [0], [0], [1], [0, 0, 1, 1], [], []>} : vector<8x128xf32>, vector<128x384xf32>, vector<8x384xf32> -> vector<8x384xf32>
    %250 = vector.extract_strided_slice %248 {offsets = [0, 0], sizes = [8, 256], strides = [1, 1]} : vector<8x384xf32> to vector<8x256xf32>
    %251 = vector.extract_strided_slice %249 {offsets = [0, 0], sizes = [8, 256], strides = [1, 1]} : vector<8x384xf32> to vector<8x256xf32>
    %252 = arith.addf %250, %251 : vector<8x256xf32>
    %cst_82 = arith.constant 5.000000e-01 : f32
    %253 = vector.broadcast %cst_82 : f32 to vector<8x256xf32>
    %254 = arith.mulf %253, %252 : vector<8x256xf32>
    %255 = math.tanh %254 : vector<8x256xf32>
    %cst_83 = arith.constant 1.000000e+00 : f32
    %256 = vector.broadcast %cst_83 : f32 to vector<8x256xf32>
    %257 = arith.addf %256, %255 : vector<8x256xf32>
    %cst_84 = arith.constant 5.000000e-01 : f32
    %258 = vector.broadcast %cst_84 : f32 to vector<8x256xf32>
    %259 = arith.mulf %258, %257 : vector<8x256xf32>
    %260 = vector.extract_strided_slice %259 {offsets = [0, 0], sizes = [8, 128], strides = [1, 1]} : vector<8x256xf32> to vector<8x128xf32>
    %261 = vector.extract_strided_slice %259 {offsets = [0, 128], sizes = [8, 128], strides = [1, 1]} : vector<8x256xf32> to vector<8x128xf32>
    %262 = vector.extract_strided_slice %248 {offsets = [0, 256], sizes = [8, 128], strides = [1, 1]} : vector<8x384xf32> to vector<8x128xf32>
    %263 = vector.extract_strided_slice %249 {offsets = [0, 256], sizes = [8, 128], strides = [1, 1]} : vector<8x384xf32> to vector<8x128xf32>
    %264 = arith.addf %263, %11 : vector<8x128xf32>
    %265 = arith.mulf %260, %264 : vector<8x128xf32>
    %266 = arith.addf %262, %265 : vector<8x128xf32>
    %267 = math.tanh %266 : vector<8x128xf32>
    %cst_85 = arith.constant 1.000000e+00 : f32
    %268 = vector.broadcast %cst_85 : f32 to vector<8x128xf32>
    %269 = arith.subf %268, %261 : vector<8x128xf32>
    %270 = arith.mulf %269, %267 : vector<8x128xf32>
    %271 = arith.mulf %261, %237 : vector<8x128xf32>
    %272 = arith.addf %270, %271 : vector<8x128xf32>
    %273 = vector.broadcast %244 : i32 to vector<8x1xi32>
    %274 = arith.cmpi sgt, %3, %273 : vector<8x1xi32>
    %275 = arith.extui %274 : vector<8x1xi1> to vector<8x1xi32>
    %276 = arith.sitofp %275 : vector<8x1xi32> to vector<8x1xf32>
    %277 = vector.broadcast %276 : vector<8x1xf32> to vector<8x128xf32>
    %278 = arith.mulf %277, %272 : vector<8x128xf32>
    %cst_86 = arith.constant 1.000000e+00 : f32
    %279 = vector.broadcast %cst_86 : f32 to vector<8x1xf32>
    %280 = arith.subf %279, %276 : vector<8x1xf32>
    %281 = vector.broadcast %280 : vector<8x1xf32> to vector<8x128xf32>
    %282 = arith.mulf %281, %237 : vector<8x128xf32>
    %283 = arith.addf %278, %282 : vector<8x128xf32>
    %284 = vector.broadcast %276 : vector<8x1xf32> to vector<8x128xf32>
    %285 = arith.mulf %284, %272 : vector<8x128xf32>
    %c5_87 = arith.constant 5 : index
    %c0_88 = arith.constant 0 : index
    %c0_89 = arith.constant 0 : index
    %286 = vector.load %arg9[%c5_87, %c0_88, %c0_89] : memref<8x8x128xf32, #tpu.memory_space<vmem>>, vector<1x8x128xf32>
    %287 = vector.shape_cast %286 : vector<1x8x128xf32> to vector<8x128xf32>
    %288 = vector.shape_cast %285 : vector<8x128xf32> to vector<1x8x128xf32>
    tpu.vector_store %arg9[%c5_87, %c0_88, %c0_89], %288 {strides = array<i32>} : memref<8x8x128xf32, #tpu.memory_space<vmem>>, vector<1x8x128xf32>,
    %c8_i32_90 = arith.constant 8 : i32
    %289 = arith.muli %arg1, %c8_i32_90 : i32
    %c6_i32 = arith.constant 6 : i32
    %290 = arith.addi %289, %c6_i32 : i32
    %c6 = arith.constant 6 : index
    %c0_91 = arith.constant 0 : index
    %c0_92 = arith.constant 0 : index
    %291 = vector.load %arg2[%c6, %c0_91, %c0_92] : memref<8x8x16xf32, #tpu.memory_space<vmem>>, vector<1x8x16xf32>
    %292 = vector.shape_cast %291 : vector<1x8x16xf32> to vector<8x16xf32>
    %cst_93 = arith.constant dense<0.000000e+00> : vector<8x384xf32>
    %293 = tpu.matmul %292, %4, %cst_93 {dimension_numbers = #tpu.dot_dimension_numbers<[1], [0], [0], [1], [0, 0, 1, 1], [], []>} : vector<8x16xf32>, vector<16x384xf32>, vector<8x384xf32> -> vector<8x384xf32>
    %294 = arith.addf %293, %8 : vector<8x384xf32>
    %cst_94 = arith.constant dense<0.000000e+00> : vector<8x384xf32>
    %295 = tpu.matmul %283, %5, %cst_94 {dimension_numbers = #tpu.dot_dimension_numbers<[1], [0], [0], [1], [0, 0, 1, 1], [], []>} : vector<8x128xf32>, vector<128x384xf32>, vector<8x384xf32> -> vector<8x384xf32>
    %296 = vector.extract_strided_slice %294 {offsets = [0, 0], sizes = [8, 256], strides = [1, 1]} : vector<8x384xf32> to vector<8x256xf32>
    %297 = vector.extract_strided_slice %295 {offsets = [0, 0], sizes = [8, 256], strides = [1, 1]} : vector<8x384xf32> to vector<8x256xf32>
    %298 = arith.addf %296, %297 : vector<8x256xf32>
    %cst_95 = arith.constant 5.000000e-01 : f32
    %299 = vector.broadcast %cst_95 : f32 to vector<8x256xf32>
    %300 = arith.mulf %299, %298 : vector<8x256xf32>
    %301 = math.tanh %300 : vector<8x256xf32>
    %cst_96 = arith.constant 1.000000e+00 : f32
    %302 = vector.broadcast %cst_96 : f32 to vector<8x256xf32>
    %303 = arith.addf %302, %301 : vector<8x256xf32>
    %cst_97 = arith.constant 5.000000e-01 : f32
    %304 = vector.broadcast %cst_97 : f32 to vector<8x256xf32>
    %305 = arith.mulf %304, %303 : vector<8x256xf32>
    %306 = vector.extract_strided_slice %305 {offsets = [0, 0], sizes = [8, 128], strides = [1, 1]} : vector<8x256xf32> to vector<8x128xf32>
    %307 = vector.extract_strided_slice %305 {offsets = [0, 128], sizes = [8, 128], strides = [1, 1]} : vector<8x256xf32> to vector<8x128xf32>
    %308 = vector.extract_strided_slice %294 {offsets = [0, 256], sizes = [8, 128], strides = [1, 1]} : vector<8x384xf32> to vector<8x128xf32>
    %309 = vector.extract_strided_slice %295 {offsets = [0, 256], sizes = [8, 128], strides = [1, 1]} : vector<8x384xf32> to vector<8x128xf32>
    %310 = arith.addf %309, %11 : vector<8x128xf32>
    %311 = arith.mulf %306, %310 : vector<8x128xf32>
    %312 = arith.addf %308, %311 : vector<8x128xf32>
    %313 = math.tanh %312 : vector<8x128xf32>
    %cst_98 = arith.constant 1.000000e+00 : f32
    %314 = vector.broadcast %cst_98 : f32 to vector<8x128xf32>
    %315 = arith.subf %314, %307 : vector<8x128xf32>
    %316 = arith.mulf %315, %313 : vector<8x128xf32>
    %317 = arith.mulf %307, %283 : vector<8x128xf32>
    %318 = arith.addf %316, %317 : vector<8x128xf32>
    %319 = vector.broadcast %290 : i32 to vector<8x1xi32>
    %320 = arith.cmpi sgt, %3, %319 : vector<8x1xi32>
    %321 = arith.extui %320 : vector<8x1xi1> to vector<8x1xi32>
    %322 = arith.sitofp %321 : vector<8x1xi32> to vector<8x1xf32>
    %323 = vector.broadcast %322 : vector<8x1xf32> to vector<8x128xf32>
    %324 = arith.mulf %323, %318 : vector<8x128xf32>
    %cst_99 = arith.constant 1.000000e+00 : f32
    %325 = vector.broadcast %cst_99 : f32 to vector<8x1xf32>
    %326 = arith.subf %325, %322 : vector<8x1xf32>
    %327 = vector.broadcast %326 : vector<8x1xf32> to vector<8x128xf32>
    %328 = arith.mulf %327, %283 : vector<8x128xf32>
    %329 = arith.addf %324, %328 : vector<8x128xf32>
    %330 = vector.broadcast %322 : vector<8x1xf32> to vector<8x128xf32>
    %331 = arith.mulf %330, %318 : vector<8x128xf32>
    %c6_100 = arith.constant 6 : index
    %c0_101 = arith.constant 0 : index
    %c0_102 = arith.constant 0 : index
    %332 = vector.load %arg9[%c6_100, %c0_101, %c0_102] : memref<8x8x128xf32, #tpu.memory_space<vmem>>, vector<1x8x128xf32>
    %333 = vector.shape_cast %332 : vector<1x8x128xf32> to vector<8x128xf32>
    %334 = vector.shape_cast %331 : vector<8x128xf32> to vector<1x8x128xf32>
    tpu.vector_store %arg9[%c6_100, %c0_101, %c0_102], %334 {strides = array<i32>} : memref<8x8x128xf32, #tpu.memory_space<vmem>>, vector<1x8x128xf32>,
    %c8_i32_103 = arith.constant 8 : i32
    %335 = arith.muli %arg1, %c8_i32_103 : i32
    %c7_i32 = arith.constant 7 : i32
    %336 = arith.addi %335, %c7_i32 : i32
    %c7 = arith.constant 7 : index
    %c0_104 = arith.constant 0 : index
    %c0_105 = arith.constant 0 : index
    %337 = vector.load %arg2[%c7, %c0_104, %c0_105] : memref<8x8x16xf32, #tpu.memory_space<vmem>>, vector<1x8x16xf32>
    %338 = vector.shape_cast %337 : vector<1x8x16xf32> to vector<8x16xf32>
    %cst_106 = arith.constant dense<0.000000e+00> : vector<8x384xf32>
    %339 = tpu.matmul %338, %4, %cst_106 {dimension_numbers = #tpu.dot_dimension_numbers<[1], [0], [0], [1], [0, 0, 1, 1], [], []>} : vector<8x16xf32>, vector<16x384xf32>, vector<8x384xf32> -> vector<8x384xf32>
    %340 = arith.addf %339, %8 : vector<8x384xf32>
    %cst_107 = arith.constant dense<0.000000e+00> : vector<8x384xf32>
    %341 = tpu.matmul %329, %5, %cst_107 {dimension_numbers = #tpu.dot_dimension_numbers<[1], [0], [0], [1], [0, 0, 1, 1], [], []>} : vector<8x128xf32>, vector<128x384xf32>, vector<8x384xf32> -> vector<8x384xf32>
    %342 = vector.extract_strided_slice %340 {offsets = [0, 0], sizes = [8, 256], strides = [1, 1]} : vector<8x384xf32> to vector<8x256xf32>
    %343 = vector.extract_strided_slice %341 {offsets = [0, 0], sizes = [8, 256], strides = [1, 1]} : vector<8x384xf32> to vector<8x256xf32>
    %344 = arith.addf %342, %343 : vector<8x256xf32>
    %cst_108 = arith.constant 5.000000e-01 : f32
    %345 = vector.broadcast %cst_108 : f32 to vector<8x256xf32>
    %346 = arith.mulf %345, %344 : vector<8x256xf32>
    %347 = math.tanh %346 : vector<8x256xf32>
    %cst_109 = arith.constant 1.000000e+00 : f32
    %348 = vector.broadcast %cst_109 : f32 to vector<8x256xf32>
    %349 = arith.addf %348, %347 : vector<8x256xf32>
    %cst_110 = arith.constant 5.000000e-01 : f32
    %350 = vector.broadcast %cst_110 : f32 to vector<8x256xf32>
    %351 = arith.mulf %350, %349 : vector<8x256xf32>
    %352 = vector.extract_strided_slice %351 {offsets = [0, 0], sizes = [8, 128], strides = [1, 1]} : vector<8x256xf32> to vector<8x128xf32>
    %353 = vector.extract_strided_slice %351 {offsets = [0, 128], sizes = [8, 128], strides = [1, 1]} : vector<8x256xf32> to vector<8x128xf32>
    %354 = vector.extract_strided_slice %340 {offsets = [0, 256], sizes = [8, 128], strides = [1, 1]} : vector<8x384xf32> to vector<8x128xf32>
    %355 = vector.extract_strided_slice %341 {offsets = [0, 256], sizes = [8, 128], strides = [1, 1]} : vector<8x384xf32> to vector<8x128xf32>
    %356 = arith.addf %355, %11 : vector<8x128xf32>
    %357 = arith.mulf %352, %356 : vector<8x128xf32>
    %358 = arith.addf %354, %357 : vector<8x128xf32>
    %359 = math.tanh %358 : vector<8x128xf32>
    %cst_111 = arith.constant 1.000000e+00 : f32
    %360 = vector.broadcast %cst_111 : f32 to vector<8x128xf32>
    %361 = arith.subf %360, %353 : vector<8x128xf32>
    %362 = arith.mulf %361, %359 : vector<8x128xf32>
    %363 = arith.mulf %353, %329 : vector<8x128xf32>
    %364 = arith.addf %362, %363 : vector<8x128xf32>
    %365 = vector.broadcast %336 : i32 to vector<8x1xi32>
    %366 = arith.cmpi sgt, %3, %365 : vector<8x1xi32>
    %367 = arith.extui %366 : vector<8x1xi1> to vector<8x1xi32>
    %368 = arith.sitofp %367 : vector<8x1xi32> to vector<8x1xf32>
    %369 = vector.broadcast %368 : vector<8x1xf32> to vector<8x128xf32>
    %370 = arith.mulf %369, %364 : vector<8x128xf32>
    %cst_112 = arith.constant 1.000000e+00 : f32
    %371 = vector.broadcast %cst_112 : f32 to vector<8x1xf32>
    %372 = arith.subf %371, %368 : vector<8x1xf32>
    %373 = vector.broadcast %372 : vector<8x1xf32> to vector<8x128xf32>
    %374 = arith.mulf %373, %329 : vector<8x128xf32>
    %375 = arith.addf %370, %374 : vector<8x128xf32>
    %376 = vector.broadcast %368 : vector<8x1xf32> to vector<8x128xf32>
    %377 = arith.mulf %376, %364 : vector<8x128xf32>
    %c7_113 = arith.constant 7 : index
    %c0_114 = arith.constant 0 : index
    %c0_115 = arith.constant 0 : index
    %378 = vector.load %arg9[%c7_113, %c0_114, %c0_115] : memref<8x8x128xf32, #tpu.memory_space<vmem>>, vector<1x8x128xf32>
    %379 = vector.shape_cast %378 : vector<1x8x128xf32> to vector<8x128xf32>
    %380 = vector.shape_cast %377 : vector<8x128xf32> to vector<1x8x128xf32>
    tpu.vector_store %arg9[%c7_113, %c0_114, %c0_115], %380 {strides = array<i32>} : memref<8x8x128xf32, #tpu.memory_space<vmem>>, vector<1x8x128xf32>,
    %c0_116 = arith.constant 0 : index
    %c0_117 = arith.constant 0 : index
    %381 = vector.load %arg11[%c0_116, %c0_117] : memref<8x128xf32, #tpu.memory_space<vmem>>, vector<8x128xf32>
    tpu.vector_store %arg11[%c0_116, %c0_117], %375 {strides = array<i32>} : memref<8x128xf32, #tpu.memory_space<vmem>>, vector<8x128xf32>,
    %c0_i32_118 = arith.constant 0 : i32
    %382 = arith.cmpi eq, %arg1, %c0_i32_118 : i32
    %383 = arith.extui %382 : i1 to i32
    %c0_i32_119 = arith.constant 0 : i32
    %384 = arith.cmpi ne, %383, %c0_i32_119 : i32
    scf.if %384 {
      %c0_i32_120 = arith.constant 0 : i32
      %385 = vector.broadcast %c0_i32_120 : i32 to vector<8x1xi32>
      %386 = arith.cmpi sgt, %3, %385 : vector<8x1xi32>
      %387 = arith.extui %386 : vector<8x1xi1> to vector<8x1xi32>
      %388 = arith.sitofp %387 : vector<8x1xi32> to vector<8x1xf32>
      %389 = vector.broadcast %388 : vector<8x1xf32> to vector<8x128xf32>
      %390 = arith.mulf %375, %389 : vector<8x128xf32>
      %c0_121 = arith.constant 0 : index
      %c0_122 = arith.constant 0 : index
      %391 = vector.load %arg10[%c0_121, %c0_122] : memref<8x128xf32, #tpu.memory_space<vmem>>, vector<8x128xf32>
      tpu.vector_store %arg10[%c0_121, %c0_122], %390 {strides = array<i32>} : memref<8x128xf32, #tpu.memory_space<vmem>>, vector<8x128xf32>,
    } else {
    }
    return
  }
  func.func @transform_0(%arg0: i32, %arg1: i32) -> (i32, i32, i32) {
    %c0_i32 = arith.constant 0 : i32
    %c0_i32_0 = arith.constant 0 : i32
    return %arg1, %arg0, %c0_i32 : i32, i32, i32
  }
  func.func @transform_1(%arg0: i32, %arg1: i32) -> (i32, i32) {
    %c0_i32 = arith.constant 0 : i32
    %c0_i32_0 = arith.constant 0 : i32
    return %arg0, %c0_i32 : i32, i32
  }
  func.func @transform_2(%arg0: i32, %arg1: i32) -> (i32, i32) {
    %c0_i32 = arith.constant 0 : i32
    %c0_i32_0 = arith.constant 0 : i32
    return %arg0, %c0_i32 : i32, i32
  }
  func.func @transform_3(%arg0: i32, %arg1: i32) -> (i32, i32) {
    %c0_i32 = arith.constant 0 : i32
    %c0_i32_0 = arith.constant 0 : i32
    %c0_i32_1 = arith.constant 0 : i32
    return %c0_i32, %c0_i32_0 : i32, i32
  }
  func.func @transform_4(%arg0: i32, %arg1: i32) -> (i32, i32) {
    %c0_i32 = arith.constant 0 : i32
    %c0_i32_0 = arith.constant 0 : i32
    %c0_i32_1 = arith.constant 0 : i32
    return %c0_i32, %c0_i32_0 : i32, i32
  }
  func.func @transform_5(%arg0: i32, %arg1: i32) -> (i32, i32) {
    %c0_i32 = arith.constant 0 : i32
    %c0_i32_0 = arith.constant 0 : i32
    %c0_i32_1 = arith.constant 0 : i32
    return %c0_i32, %c0_i32_0 : i32, i32
  }
  func.func @transform_6(%arg0: i32, %arg1: i32) -> (i32, i32) {
    %c0_i32 = arith.constant 0 : i32
    %c0_i32_0 = arith.constant 0 : i32
    %c0_i32_1 = arith.constant 0 : i32
    return %c0_i32, %c0_i32_0 : i32, i32
  }
  func.func @transform_7(%arg0: i32, %arg1: i32) -> (i32, i32, i32) {
    %c0_i32 = arith.constant 0 : i32
    %c0_i32_0 = arith.constant 0 : i32
    return %arg1, %arg0, %c0_i32 : i32, i32, i32
  }
  func.func @transform_8(%arg0: i32, %arg1: i32) -> (i32, i32) {
    %c0_i32 = arith.constant 0 : i32
    %c0_i32_0 = arith.constant 0 : i32
    return %arg0, %c0_i32 : i32, i32
  }
}

</mosaic_0001>

<bundles_post_ra>
// kernel: my_gru_forward.1
= control target key start
LH: loop header
LB: loop body
LE: loop exit
PB: predicated region body
PF: predicated region fallthrough
CT: control target
= control target key end

     0   :  { %14 = vsyncpa [#allocation4], 0  ;;  %v3939_v5 = vmov 0.0   ;;  %v3940_v8 = vmov 0.0|0.0   ;;  %vm3941_vm0 = vmmov 0   ;;  %v3942_v13 = vmov 0   ;;  %s4727_s0 = inlined_call_operand.vmem [shape: f32[8,8,16], index: 0, kind: input, shape index: {}]   ;;  %s4728_s1 = inlined_call_operand.vmem [shape: s32[8,1], index: 1, kind: input, shape index: {}]   ;;  %s4729_s2 = inlined_call_operand.vmem [shape: f32[8,128], index: 2, kind: input, shape index: {}]   ;;  %s4730_s3 = inlined_call_operand.vmem [shape: f32[16,384], index: 3, kind: input, shape index: {}]   ;;  %s4731_s4 = inlined_call_operand.vmem [shape: f32[1,384], index: 4, kind: input, shape index: {}]   ;;  %s4732_s5 = inlined_call_operand.vmem [shape: f32[128,384], index: 5, kind: input, shape index: {}]   ;;  %s4733_s6 = inlined_call_operand.vmem [shape: f32[1,128], index: 6, kind: input, shape index: {}]   ;;  %s4734_s7 = inlined_call_operand.hbm [shape: f32[8,8,128], index: 7, kind: output, shape index: {0}]   ;;  %s4735_s8 = inlined_call_operand.hbm [shape: f32[8,128], index: 8, kind: output, shape index: {1}]  }
   0x1   :  { %v38_v0 = vld [vmem:[%s4730_s3 + $0x8] sm:$0xff]  ;;  %v41_v1 = vld [vmem:[%s4730_s3 + $0x20] sm:$0xff]  ;;  %v40_v4 = vld [vmem:[%s4730_s3 + $0x18] sm:$0xff]  ;;  %186 = vmatprep.mubr.f32.mxu0 %v3939_v5  ;;  %3300 = vmatprep.subr.bf16.mxu1 %v3940_v8  ;;  %vm118_vm1 = vcmask 130048  }
   0x2   :  { %v37_v2 = vld [vmem:[%s4730_s3] sm:$0xff]  ;;  %v4001_v3 = vpack.c.bf16 %v41_v1, %v38_v0  ;;  %v44_v6 = vld [vmem:[%s4732_s5 + $0x8] sm:$0xff]  ;;  %v46_v12 = vld [vmem:[%s4732_s5 + $0x18] sm:$0xff]  ;;  %2964 = vmatprep.mubr.msk.f32.mxu1 %vm3941_vm0, %v3939_v5  ;;  %3840 = vset.pattern.permute.xlu0 %v3942_v13 }
   0x3   :  { %v47_v7 = vld [vmem:[%s4732_s5 + $0x20] sm:$0xff]  ;;  %v4014_v9 = vpack.c.bf16 %v40_v4, %v37_v2  ;;  %v50_v14 = vld [vmem:[%s4732_s5 + $0x38] sm:$0xff]  ;;  %v53_v15 = vld [vmem:[%s4732_s5 + $0x50] sm:$0xff]  ;;  %3841 = vset.pattern.permute.xlu1 %v3942_v13 }
   0x4   :  { %v4016_v10 = vpack.c.bf16 %v47_v7, %v44_v6  ;;  %v43_v11 = vld [vmem:[%s4732_s5] sm:$0xff]  ;;  %3297 = vmatprep.subr.bf16.mxu0 %v4001_v3  ;;  %v4040_v18 = vpack.c.bf16 %v53_v15, %v50_v14  ;;  %v49_v19 = vld [vmem:[%s4732_s5 + $0x30] sm:$0xff]  ;;  %v52_v20 = vld [vmem:[%s4732_s5 + $0x48] sm:$0xff] }
   0x5   :  { %3299 = vmatpush1.bf16.msra.mxu0 %v4014_v9  ;;  %v117_v16 = vld [vmem:[%s4727_s0] sm:$0xff]  ;;  %v4037_v17 = vpack.c.bf16 %v46_v12, %v43_v11  ;;  %v56_v21 = vld [vmem:[%s4732_s5 + $0x68] sm:$0xff]  ;;  %v39_v23 = vld [vmem:[%s4730_s3 + $0x10] sm:$0xff]  ;;  %v4064_v26 = vpack.c.bf16 %v52_v20, %v49_v19 }
   0x6   :  { %3304 = vmatprep.subr.bf16.mxu0 %v4016_v10  ;;  %v59_v22 = vld [vmem:[%s4732_s5 + $0x80] sm:$0xff]  ;;  %v42_v24 = vld [vmem:[%s4730_s3 + $0x28] sm:$0xff]  ;;  %v58_v29 = vld [vmem:[%s4732_s5 + $0x78] sm:$0xff] }
   0x7   :  { %v4061_v25 = vpack.c.bf16 %v42_v24, %v39_v23  ;;  %v55_v27 = vld [vmem:[%s4732_s5 + $0x60] sm:$0xff]  ;;  %v4071_v28 = vpack.c.bf16 %v59_v22, %v56_v21  ;;  %v45_v30 = vld [vmem:[%s4732_s5 + $0x10] sm:$0xff]  ;;  %v48_v31 = vld [vmem:[%s4732_s5 + $0x28] sm:$0xff] }
   0x8   :  { %2768 = vmatmul.mubr.msk.f32.vlgmr.msra.gmra.mrb[0].mxu0 %vm118_vm1, %v117_v16  ;;  %v62_v32 = vld [vmem:[%s4732_s5 + $0x98] sm:$0xff]  ;;  %v65_v33 = vld [vmem:[%s4732_s5 + $0xb0] sm:$0xff]  ;;  %v4090_v34 = vpack.c.bf16 %v48_v31, %v45_v30  ;;  %v51_v35 = vld [vmem:[%s4732_s5 + $0x40] sm:$0xff]  ;;  %v4099_v37 = vpack.c.bf16 %v58_v29, %v55_v27 }
   0x9   :  { %3306 = vmatpush1.bf16.msra.mxu0 %v4037_v17  ;;  %327 = vmatprep.mubr.f32.mxu0 %v3939_v5  ;;  %v54_v36 = vld [vmem:[%s4732_s5 + $0x58] sm:$0xff]  ;;  %v4103_v38 = vpack.c.bf16 %v65_v33, %v62_v32  ;;  %v61_v39 = vld [vmem:[%s4732_s5 + $0x90] sm:$0xff]  ;;  %v64_v40 = vld [vmem:[%s4732_s5 + $0xa8] sm:$0xff] }
   0xa   :  { %3308 = vmatprep.subr.bf16.mxu0 %v4040_v18  ;;  %3302 = vmatpush3.bf16.msra.mxu1 %v4061_v25  ;;  %v68_v41 = vld [vmem:[%s4732_s5 + $0xc8] sm:$0xff]  ;;  %v4115_v42 = vpack.c.bf16 %v54_v36, %v51_v35  ;;  %v71_v43 = vld [vmem:[%s4732_s5 + $0xe0] sm:$0xff]  ;;  %v57_v44 = vld [vmem:[%s4732_s5 + $0x70] sm:$0xff]  ;;  %v4130_v46 = vpack.c.bf16 %v64_v40, %v61_v39 }
   0xb   :  { %3335 = vmatprep.subr.bf16.mxu1 %v3940_v8  ;;  %v60_v45 = vld [vmem:[%s4732_s5 + $0x88] sm:$0xff]  ;;  %v67_v47 = vld [vmem:[%s4732_s5 + $0xc0] sm:$0xff]  ;;  %v4136_v48 = vpack.c.bf16 %v71_v43, %v68_v41  ;;  %v70_v49 = vld [vmem:[%s4732_s5 + $0xd8] sm:$0xff] }
   0xc   :  { %v74_v50 = vld [vmem:[%s4732_s5 + $0xf8] sm:$0xff]  ;;  %v77_v51 = vld [vmem:[%s4732_s5 + $0x110] sm:$0xff]  ;;  %v4148_v52 = vpack.c.bf16 %v60_v45, %v57_v44  ;;  %v63_v53 = vld [vmem:[%s4732_s5 + $0xa0] sm:$0xff]  ;;  %v4164_v56 = vpack.c.bf16 %v70_v49, %v67_v47 }
   0xd   :  { %3310 = vmatpush1.bf16.msra.mxu0 %v4064_v26  ;;  %2965 = vmatmul.mubr.msk.f32.vlgmr.msra.gmra.mrb[0].mxu1 %vm118_vm1, %v117_v16  ;;  %v66_v54 = vld [vmem:[%s4732_s5 + $0xb8] sm:$0xff]  ;;  %v4160_v55 = vld [vmem:[%s4728_s1] sm:$0xff] }
   0xe   :  { %3312 = vmatprep.subr.bf16.mxu0 %v4071_v28  ;;  %3337 = vmatpush3.bf16.msra.mxu1 %v4090_v34  ;;  %vm423_vm2 = vcmp.gt.s32.totalorder %v4160_v55, 0 }
   0xf   :  { %3338 = vmatprep.subr.bf16.mxu1 %v3940_v8  ;;  %2999 = vmatprep.mubr.msk.f32.mxu1 %vm3941_vm0, %v3939_v5  ;;  %v4167_v57 = vsel %vm423_vm2, 1.0, %v3939_v5 }
  0x11   :  { %3314 = vmatpush1.bf16.msra.mxu0 %v4099_v37 }
  0x12   :  { %3316 = vmatprep.subr.bf16.mxu0 %v4103_v38  ;;  %3340 = vmatpush3.bf16.msra.mxu1 %v4115_v42 }
  0x13   :  { %3341 = vmatprep.subr.bf16.mxu1 %v3940_v8 }
  0x15   :  { %3318 = vmatpush1.bf16.msra.mxu0 %v4130_v46 }
  0x16   :  { %15 = vsyncpa [#allocation6], 0  ;;  %3320 = vmatprep.subr.bf16.mxu0 %v4136_v48  ;;  %v4170_v58 = vpack.c.bf16 %v77_v51, %v74_v50  ;;  %v73_v59 = vld [vmem:[%s4732_s5 + $0xf0] sm:$0xff]  ;;  %v76_v60 = vld [vmem:[%s4732_s5 + $0x108] sm:$0xff]  ;;  %3343 = vmatpush3.bf16.msra.mxu1 %v4148_v52  ;;  %v4182_v62 = vpack.c.bf16 %v66_v54, %v63_v53  ;;  %v432_v2 = vsub.f32 1.0, %v4167_v57  ;;  %vm748_vm3 = vcmp.gt.s32.totalorder %v4160_v55, 1 }
  0x17   :  { %v80_v61 = vld [vmem:[%s4732_s5 + $0x128] sm:$0xff]  ;;  %v83_v63 = vld [vmem:[%s4732_s5 + $0x140] sm:$0xff]  ;;  %3344 = vmatprep.subr.bf16.mxu1 %v3940_v8  ;;  %v69_v0 = vld [vmem:[%s4732_s5 + $0xd0] sm:$0xff]  ;;  %428 = vperm.xlu0 %3840, %v4167_v57   ;;  %v4198_v4 = vpack.c.bf16 %v76_v60, %v73_v59  ;;  %vm1074_vm4 = vcmp.gt.s32.totalorder %v4160_v55, 2  ;;  %v2774_v6 = vsel %vm748_vm3, 1.0, %v3939_v5  ;;  %vm1400_vm5 = vcmp.gt.s32.totalorder %v4160_v55, 3 }
  0x18   :  { %v72_v1 = vld [vmem:[%s4732_s5 + $0xe8] sm:$0xff]  ;;  %v4203_v7 = vpack.c.bf16 %v83_v63, %v80_v61  ;;  %v79_v11 = vld [vmem:[%s4732_s5 + $0x120] sm:$0xff]  ;;  %v82_v12 = vld [vmem:[%s4732_s5 + $0x138] sm:$0xff]  ;;  %v2778_v20 = vsel %vm1074_vm4, 1.0, %v3939_v5  ;;  %753 = vperm.xlu1 %3841, %v2774_v6   ;;  %v757_v21 = vsub.f32 1.0, %v2774_v6  ;;  %v2782_v33 = vsel %vm1400_vm5, 1.0, %v3939_v5 }
  0x19   :  { %3322 = vmatpush1.bf16.msra.mxu0 %v4164_v56  ;;  %v86_v13 = vld [vmem:[%s4732_s5 + $0x158] sm:$0xff]  ;;  %v4215_v14 = vpack.c.bf16 %v72_v1, %v69_v0  ;;  %v89_v15 = vld [vmem:[%s4732_s5 + $0x170] sm:$0xff]  ;;  %v75_v16 = vld [vmem:[%s4732_s5 + $0x100] sm:$0xff]  ;;  %v4229_v22 = vpack.c.bf16 %v82_v12, %v79_v11  ;;  %v1083_v32 = vsub.f32 1.0, %v2778_v20  ;;  %vm1726_vm6 = vcmp.gt.s32.totalorder %v4160_v55, 4  ;;  %s3943_s18 = smov [#allocation3]  }
  0x1a   :  { %3324 = vmatprep.subr.bf16.mxu0 %v4170_v58  ;;  %3346 = vmatpush3.bf16.msra.mxu1 %v4182_v62  ;;  %v78_v19 = vld [vmem:[%s4732_s5 + $0x118] sm:$0xff]  ;;  %v4233_v23 = vpack.c.bf16 %v89_v15, %v86_v13  ;;  %v85_v24 = vld [vmem:[%s4732_s5 + $0x150] sm:$0xff]  ;;  %v88_v27 = vld [vmem:[%s4732_s5 + $0x168] sm:$0xff]  ;;  %v1409_v41 = vsub.f32 1.0, %v2782_v33  ;;  %v2786_v43 = vsel %vm1726_vm6, 1.0, %v3939_v5  ;;  %vm2052_vm7 = vcmp.gt.s32.totalorder %v4160_v55, 5 }
  0x1b   :  { %3347 = vmatprep.subr.bf16.mxu1 %v3940_v8  ;;  %435 = vperm.xlu0 %3840, %v432_v2   ;;  %v4242_v29 = vpack.c.bf16 %v78_v19, %v75_v16  ;;  %v81_v30 = vld [vmem:[%s4732_s5 + $0x130] sm:$0xff]  ;;  %v84_v31 = vld [vmem:[%s4732_s5 + $0x148] sm:$0xff]  ;;  %v4253_v35 = vpack.c.bf16 %v88_v27, %v85_v24  ;;  %v87_v39 = vld [vmem:[%s4732_s5 + $0x160] sm:$0xff]  ;;  %v1735_v47 = vsub.f32 1.0, %v2786_v43  ;;  %v2790_v49 = vsel %vm2052_vm7, 1.0, %v3939_v5  ;;  %s2742_s19 = sshll.u32 %s3943_s18, 4  ;;  %s2743_s19 = int_to_ptr.vmem [resolvable:$true] %s2742_s19 }
  0x1c   :  { %760 = vperm.xlu1 %3841, %v757_v21   ;;  %v4258_v36 = vpack.c.bf16 %v84_v31, %v81_v30  ;;  %v90_v40 = vld [vmem:[%s4732_s5 + $0x178] sm:$0xff]  ;;  %v4272_v44 = vld [vmem:[%s4729_s2] sm:$0xff]  ;;  %vm2378_vm8 = vcmp.gt.s32.totalorder %v4160_v55, 6  ;;  %v2061_v50 = vsub.f32 1.0, %v2790_v49  ;;  %vm2704_vm9 = vcmp.gt.s32.totalorder %v4160_v55, 7  ;;  %v2771_v55 = vld [vmem:[%s4727_s0 + $0x8] sm:$0xff]  ;;  %p3896_p1 = scmp.lt.s32.totalorder %s2743_s19, %s2743_s19 }
  0x1d   :  { %3326 = vmatpush1.bf16.msra.mxu0 %v4198_v4  ;;  %v4276_v45 = vpack.c.bf16 %v90_v40, %v87_v39  ;;  %v2794_v51 = vsel %vm2378_vm8, 1.0, %v3939_v5  ;;  %v2798_v54 = vsel %vm2704_vm9, 1.0, %v3939_v5  ;;  %v93_v61 = vlaneseq  ;;  %v91_v1 = vld [vmem:[%s4731_s4] sm:$0x7]  ;;  %s3891_s20 = scalar_lea.vmem %s2743_s19, 1024 }
  0x1e   :  { %3328 = vmatprep.subr.bf16.mxu0 %v4203_v7  ;;  %3349 = vmatpush3.bf16.msra.mxu1 %v4215_v14  ;;  %v2387_v53 = vsub.f32 1.0, %v2794_v51  ;;  %v2713_v59 = vsub.f32 1.0, %v2798_v54  ;;  %v4349_v30 = vld [vmem:[%s4733_s6] ss:$0 sm:$0xff]  ;;  %p3892_p0 = scmp.ne.s32.totalorder %s2743_s19, %s3891_s20  ;;  %p3897_p2 = scmp.lt.s32.totalorder %s3891_s20, %s3891_s20 }
  0x1f   :  { %3350 = vmatprep.subr.bf16.mxu1 %v3940_v8  ;;  %1079 = vperm.xlu0 %3840, %v2778_v20   ;;  %v94_v63 = vshrl.u32 %v93_v61, 7 }
  0x20   :  { %1086 = vperm.xlu1 %3841, %v1083_v32   ;;  %p3898_p3 = por %p3897_p2, %p3896_p1 }
  0x21   :  { %3330 = vmatpush1.bf16.msra.mxu0 %v4229_v22  ;;  %v95_v0 = vsub.s32 0, %v94_v63  ;;  %v99_v2 = vsub.s32 1, %v94_v63  ;;  %v103_v27 = vsub.s32 2, %v94_v63 }
  0x22   :  { %3332 = vmatprep.subr.bf16.mxu0 %v4233_v23  ;;  %3352 = vmatpush3.bf16.msra.mxu1 %v4242_v29  ;;  %p3899_p4 = pnand %p3898_p3, %p3892_p0 }
  0x23   :  { %3353 = vmatprep.subr.bf16.mxu1 %v3940_v8  ;;  %1405 = vperm.xlu0 %3840, %v2782_v33   ;;  %v4340_v6 = vrot.slane %v91_v1, %v95_v0  ;;  %v4342_v12 = vrot.slane %v91_v1, %v99_v2  ;;  %v4351_v32 = vrot.slane %v91_v1, %v103_v27 }
  0x24   :  { %1412 = vperm.xlu1 %3841, %v1409_v41  }
  0x25   :  { %3334 = vmatpush1.bf16.msra.mxu0 %v4253_v35 }
  0x26   :  { %3355 = vmatpush3.bf16.msra.mxu1 %v4258_v36  ;;  %3360 = vmatprep.subr.bf16.mxu0 %v4001_v3 }
  0x27   :  { %3356 = vmatprep.subr.bf16.mxu1 %v3940_v8  ;;  %1731 = vperm.xlu0 %3840, %v2786_v43  }
  0x28   :  { %328 = vmatmul.mubr.f32.vlgmr.msra.gmra.mrb[0].mxu0 %v4272_v44  ;;  %1738 = vperm.xlu1 %3841, %v1735_v47  }
  0x29   :  { %3362 = vmatpush1.bf16.msra.mxu0 %v4014_v9  ;;  %511 = vmatprep.mubr.f32.mxu0 %v3939_v5 }
  0x2a   :  { %3358 = vmatpush3.bf16.msra.mxu1 %v4276_v45  ;;  %3367 = vmatprep.subr.bf16.mxu0 %v4016_v10 }
  0x2b   :  { %2057 = vperm.xlu0 %3840, %v2790_v49   ;;  %3363 = vmatprep.subr.bf16.mxu1 %v3940_v8 }
  0x2c   :  { %2064 = vperm.xlu1 %3841, %v2061_v50   ;;  %2772 = vmatmul.mubr.msk.f32.vlgmr.msra.gmra.mrb[2].mxu0 %vm118_vm1, %v2771_v55 }
  0x2d   :  { %3000 = vmatmul.mubr.f32.vlgmr.msra.gmra.mrb[2].mxu1 %v4272_v44  ;;  %3369 = vmatpush1.bf16.msra.mxu0 %v4037_v17 }
  0x2e   :  { %3365 = vmatpush3.bf16.msra.mxu1 %v4061_v25  ;;  %3006 = vmatprep.mubr.msk.f32.mxu1 %vm3941_vm0, %v3939_v5 }
  0x2f   :  { %2383 = vperm.xlu0 %3840, %v2794_v51   ;;  %3398 = vmatprep.subr.bf16.mxu1 %v3940_v8 }
  0x30   :  { %2390 = vperm.xlu1 %3841, %v2387_v53   ;;  %3371 = vmatprep.subr.bf16.mxu0 %v4040_v18 }
  0x31   :  { %3007 = vmatmul.mubr.msk.f32.vlgmr.msra.gmra.mrb[4].mxu1 %vm118_vm1, %v2771_v55  ;;  %652 = vmatprep.mubr.f32.mxu0 %v3939_v5 }
  0x32   :  { %3400 = vmatpush3.bf16.msra.mxu1 %v4090_v34  ;;  %3041 = vmatprep.mubr.msk.f32.mxu1 %vm3941_vm0, %v3939_v5 }
  0x33   :  { %2709 = vperm.xlu0 %3840, %v2798_v54   ;;  %3401 = vmatprep.subr.bf16.mxu1 %v3940_v8 }
  0x34   :  { %2716 = vperm.xlu1 %3841, %v2713_v59   ;;  %3373 = vmatpush1.bf16.msra.mxu0 %v4064_v26 }
  0x35   :  { %3375 = vmatprep.subr.bf16.mxu0 %v4071_v28 }
  0x36   :  { %3403 = vmatpush3.bf16.msra.mxu1 %v4115_v42 }
  0x37   :  { %2732 = vperm.xlu0 %3840, %v4167_v57   ;;  %3404 = vmatprep.subr.bf16.mxu1 %v3940_v8 }
  0x38   :  { %3377 = vmatpush1.bf16.msra.mxu0 %v4099_v37 }
  0x39   :  { %3379 = vmatprep.subr.bf16.mxu0 %v4103_v38 }
  0x3a   :  { %3406 = vmatpush3.bf16.msra.mxu1 %v4148_v52 }
  0x3b   :  { %3407 = vmatprep.subr.bf16.mxu1 %v3940_v8 }
  0x3c   :  { %3381 = vmatpush1.bf16.msra.mxu0 %v4130_v46 }
  0x3d   :  { %3383 = vmatprep.subr.bf16.mxu0 %v4136_v48 }
  0x3e   :  { %3409 = vmatpush3.bf16.msra.mxu1 %v4182_v62 }
  0x3f   :  { %3410 = vmatprep.subr.bf16.mxu1 %v3940_v8 }
  0x40   :  { %3385 = vmatpush1.bf16.msra.mxu0 %v4164_v56 }
  0x41   :  { %3387 = vmatprep.subr.bf16.mxu0 %v4170_v58 }
  0x42   :  { %3412 = vmatpush3.bf16.msra.mxu1 %v4215_v14 }
  0x43   :  { %3413 = vmatprep.subr.bf16.mxu1 %v3940_v8 }
  0x44   :  { %3389 = vmatpush1.bf16.msra.mxu0 %v4198_v4 }
  0x45   :  { %3391 = vmatprep.subr.bf16.mxu0 %v4203_v7 }
  0x46   :  { %3415 = vmatpush3.bf16.msra.mxu1 %v4242_v29 }
  0x47   :  { %3416 = vmatprep.subr.bf16.mxu1 %v3940_v8 }
  0x48   :  { %3393 = vmatpush1.bf16.msra.mxu0 %v4229_v22 }
  0x49   :  { %3395 = vmatprep.subr.bf16.mxu0 %v4233_v23 }
  0x4a   :  { %3418 = vmatpush3.bf16.msra.mxu1 %v4258_v36 }
  0x4b   :  { %3419 = vmatprep.subr.bf16.mxu1 %v3940_v8 }
  0x4c   :  { %3397 = vmatpush1.bf16.msra.mxu0 %v4253_v35 }
  0x4d   :  { %3423 = vmatprep.subr.bf16.mxu0 %v4001_v3 }
  0x4e   :  { %3421 = vmatpush3.bf16.msra.mxu1 %v4276_v45 }
  0x4f   :  { %3426 = vmatprep.subr.bf16.mxu1 %v3940_v8 }
  0x96   :  { %v429_v53 = vpop.permute.xlu0 %428 }
  0x9a   :  { %v436_v63 = vpop.permute.xlu0 %435 }
  0x9b   :  { %v438_v0 = vmul.f32 %v436_v63, %v4272_v44 }
  0xe0   :  { %v259_v57 = vpop.f32.mrb[0].mxu1 }
  0xe1   :  { %v2966_v60 = vpop.f32.mrb[1].mxu1  ;;  %v260_v41 = vadd.f32 %v259_v57, %v4351_v32 }
  0xfb   :  { %v329_v11 = vpop.f32.mrb[0].mxu0 }
  0xfc   :  { %v3800_v13 = vadd.f32 %v329_v11, %v4340_v6  ;;  %v331_v15 = vpop.f32.mrb[1].mxu0  ;;  %v2775_v11 = vld [vmem:[%s4727_s0 + $0x10] sm:$0xff] }
  0xfd   :  { %v3801_v19 = vadd.f32 %v331_v15, %v4342_v12 }
  0xfe   :  { %v406_v16 = vmul.f32 0.5, %v3800_v13 }
  0xff   :  { %v407_v24 = vmul.f32 0.5, %v3801_v19 }
 0x100   :  { %3842 = vtanh.f32 %v406_v16  ;;  %v400_v20 = vpop.f32.mrb[2].mxu1 }
 0x101   :  { %v3001_v21 = vpop.f32.mrb[3].mxu1  ;;  %3844 = vtanh.f32 %v407_v24  ;;  %v414_v39 = vadd.f32 %v4349_v30, %v400_v20 }
 0x10a   :  { %v3843_v31 = vpop.eup %3842 }
 0x10b   :  { %v410_v33 = vadd.f32 1.0, %v3843_v31  ;;  %v3845_v47 = vpop.eup %3844 }
 0x10c   :  { %v411_v50 = vadd.f32 1.0, %v3845_v47 }
 0x10d   :  { %v412_v40 = vmul.f32 0.5, %v410_v33 }
 0x10e   :  { %v413_v51 = vmul.f32 0.5, %v411_v50 }
 0x10f   :  { %v415_v43 = vmul.f32 %v414_v39, %v412_v40 }
 0x110   :  { %v418_v54 = vsub.f32 1.0, %v413_v51  ;;  %v420_v55 = vmul.f32 %v413_v51, %v4272_v44  ;;  %v584_v44 = vpop.f32.mrb[4].mxu1 }
 0x111   :  { %v416_v49 = vadd.f32 %v415_v43, %v260_v41  ;;  %v3008_v57 = vpop.f32.mrb[5].mxu1  ;;  %v585_v41 = vadd.f32 %v584_v44, %v4351_v32 }
 0x113   :  { %3846 = vtanh.f32 %v416_v49 }
 0x11d   :  { %v3847_v59 = vpop.eup %3846 }
 0x11e   :  { %v419_v60 = vmul.f32 %v3847_v59, %v418_v54 }
 0x120   :  { %v421_v61 = vadd.f32 %v420_v55, %v419_v60 }
 0x122   :  { %v431_v1 = vmul.f32 %v429_v53, %v421_v61  ;;  %v754_v53 = vpop.permute.xlu1 %753 }
 0x124   :  { %v4357_v2 = vadd.f32 %v438_v0, %v431_v1  ;;  %440 = vst [vmem:[#allocation3] sm:$0xff] %v431_v1 }
 0x126   :  { %653 = vmatmul.mubr.f32.vlgmr.msra.gmra.mrb[2].mxu0 %v4357_v2  ;;  %3042 = vmatmul.mubr.f32.vlgmr.msra.gmra.mrb[6].mxu1 %v4357_v2  ;;  %v761_v61 = vpop.permute.xlu1 %760 }
 0x127   :  { %3425 = vmatpush1.bf16.msra.mxu0 %v4014_v9  ;;  %3428 = vmatpush3.bf16.msra.mxu1 %v4061_v25  ;;  %v763_v0 = vmul.f32 %v761_v61, %v4357_v2  ;;  %v1080_v61 = vpop.permute.xlu0 %1079 }
 0x128   :  { %837 = vmatprep.mubr.f32.mxu0 %v3939_v5  ;;  %3048 = vmatprep.mubr.msk.f32.mxu1 %vm3941_vm0, %v3939_v5 }
 0x129   :  { %3430 = vmatprep.subr.bf16.mxu0 %v4016_v10  ;;  %3461 = vmatprep.subr.bf16.mxu1 %v3940_v8 }
 0x12a   :  { %2776 = vmatmul.mubr.msk.f32.vlgmr.msra.gmra.mrb[4].mxu0 %vm118_vm1, %v2775_v11  ;;  %3049 = vmatmul.mubr.msk.f32.vlgmr.msra.gmra.mrb[8].mxu1 %vm118_vm1, %v2775_v11  ;;  %v2779_v11 = vld [vmem:[%s4727_s0 + $0x18] sm:$0xff] }
 0x12b   :  { %3432 = vmatpush1.bf16.msra.mxu0 %v4037_v17  ;;  %3463 = vmatpush3.bf16.msra.mxu1 %v4090_v34 }
 0x12c   :  { %3434 = vmatprep.subr.bf16.mxu0 %v4040_v18  ;;  %3464 = vmatprep.subr.bf16.mxu1 %v3940_v8 }
 0x12d   :  { %978 = vmatprep.mubr.f32.mxu0 %v3939_v5  ;;  %3083 = vmatprep.mubr.msk.f32.mxu1 %vm3941_vm0, %v3939_v5 }
 0x12f   :  { %3436 = vmatpush1.bf16.msra.mxu0 %v4064_v26  ;;  %3466 = vmatpush3.bf16.msra.mxu1 %v4115_v42 }
 0x130   :  { %3438 = vmatprep.subr.bf16.mxu0 %v4071_v28  ;;  %3467 = vmatprep.subr.bf16.mxu1 %v3940_v8 }
 0x133   :  { %3440 = vmatpush1.bf16.msra.mxu0 %v4099_v37  ;;  %3469 = vmatpush3.bf16.msra.mxu1 %v4148_v52 }
 0x134   :  { %3442 = vmatprep.subr.bf16.mxu0 %v4103_v38  ;;  %3470 = vmatprep.subr.bf16.mxu1 %v3940_v8 }
 0x137   :  { %3444 = vmatpush1.bf16.msra.mxu0 %v4130_v46  ;;  %3472 = vmatpush3.bf16.msra.mxu1 %v4182_v62 }
 0x138   :  { %3446 = vmatprep.subr.bf16.mxu0 %v4136_v48  ;;  %3473 = vmatprep.subr.bf16.mxu1 %v3940_v8 }
 0x13b   :  { %3448 = vmatpush1.bf16.msra.mxu0 %v4164_v56  ;;  %3475 = vmatpush3.bf16.msra.mxu1 %v4215_v14 }
 0x13c   :  { %3450 = vmatprep.subr.bf16.mxu0 %v4170_v58  ;;  %3476 = vmatprep.subr.bf16.mxu1 %v3940_v8 }
 0x13f   :  { %3452 = vmatpush1.bf16.msra.mxu0 %v4198_v4  ;;  %3478 = vmatpush3.bf16.msra.mxu1 %v4242_v29 }
 0x140   :  { %3454 = vmatprep.subr.bf16.mxu0 %v4203_v7  ;;  %3479 = vmatprep.subr.bf16.mxu1 %v3940_v8 }
 0x143   :  { %3456 = vmatpush1.bf16.msra.mxu0 %v4229_v22  ;;  %3481 = vmatpush3.bf16.msra.mxu1 %v4258_v36 }
 0x144   :  { %3458 = vmatprep.subr.bf16.mxu0 %v4233_v23  ;;  %3482 = vmatprep.subr.bf16.mxu1 %v3940_v8 }
 0x147   :  { %3460 = vmatpush1.bf16.msra.mxu0 %v4253_v35  ;;  %3484 = vmatpush3.bf16.msra.mxu1 %v4276_v45 }
 0x148   :  { %3486 = vmatprep.subr.bf16.mxu0 %v4001_v3  ;;  %3489 = vmatprep.subr.bf16.mxu1 %v3940_v8 }
 0x1f9   :  { %v654_v13 = vpop.f32.mrb[2].mxu0  ;;  %v725_v15 = vpop.f32.mrb[6].mxu1 }
 0x1fa   :  { %v3802_v16 = vadd.f32 %v654_v13, %v4340_v6  ;;  %v656_v19 = vpop.f32.mrb[3].mxu0  ;;  %v3043_v20 = vpop.f32.mrb[7].mxu1  ;;  %v739_v40 = vadd.f32 %v4349_v30, %v725_v15 }
 0x1fb   :  { %v3803_v24 = vadd.f32 %v656_v19, %v4342_v12 }
 0x1fc   :  { %v731_v21 = vmul.f32 0.5, %v3802_v16 }
 0x1fd   :  { %v732_v27 = vmul.f32 0.5, %v3803_v24 }
 0x1fe   :  { %3848 = vtanh.f32 %v731_v21 }
 0x1ff   :  { %3850 = vtanh.f32 %v732_v27 }
 0x208   :  { %v3849_v31 = vpop.eup %3848 }
 0x209   :  { %v735_v33 = vadd.f32 1.0, %v3849_v31  ;;  %v3851_v47 = vpop.eup %3850 }
 0x20a   :  { %v736_v50 = vadd.f32 1.0, %v3851_v47 }
 0x20b   :  { %v737_v39 = vmul.f32 0.5, %v735_v33 }
 0x20c   :  { %v738_v51 = vmul.f32 0.5, %v736_v50 }
 0x20d   :  { %v740_v43 = vmul.f32 %v739_v40, %v737_v39 }
 0x20e   :  { %v743_v54 = vsub.f32 1.0, %v738_v51  ;;  %v745_v60 = vmul.f32 %v738_v51, %v4357_v2  ;;  %v910_v2 = vpop.f32.mrb[8].mxu1 }
 0x20f   :  { %v741_v49 = vadd.f32 %v740_v43, %v585_v41  ;;  %v3050_v44 = vpop.f32.mrb[9].mxu1  ;;  %v911_v41 = vadd.f32 %v910_v2, %v4351_v32 }
 0x211   :  { %3852 = vtanh.f32 %v741_v49 }
 0x21b   :  { %v3853_v59 = vpop.eup %3852 }
 0x21c   :  { %v744_v55 = vmul.f32 %v3853_v59, %v743_v54 }
 0x21e   :  { %v746_v63 = vadd.f32 %v745_v60, %v744_v55 }
 0x220   :  { %v756_v1 = vmul.f32 %v754_v53, %v746_v63  ;;  %v1087_v63 = vpop.permute.xlu1 %1086 }
 0x222   :  { %v4414_v57 = vadd.f32 %v763_v0, %v756_v1  ;;  %766 = vst [vmem:[#allocation3 + $0x8] sm:$0xff] %v756_v1 }
 0x224   :  { %979 = vmatmul.mubr.f32.vlgmr.msra.gmra.mrb[4].mxu0 %v4414_v57  ;;  %3084 = vmatmul.mubr.f32.vlgmr.msra.gmra.mrb[10].mxu1 %v4414_v57  ;;  %v1089_v0 = vmul.f32 %v1087_v63, %v4414_v57  ;;  %v1413_v63 = vpop.permute.xlu1 %1412 }
 0x225   :  { %3488 = vmatpush1.bf16.msra.mxu0 %v4014_v9  ;;  %3491 = vmatpush3.bf16.msra.mxu1 %v4061_v25 }
 0x226   :  { %1163 = vmatprep.mubr.f32.mxu0 %v3939_v5  ;;  %3090 = vmatprep.mubr.msk.f32.mxu1 %vm3941_vm0, %v3939_v5 }
 0x227   :  { %3493 = vmatprep.subr.bf16.mxu0 %v4016_v10  ;;  %3524 = vmatprep.subr.bf16.mxu1 %v3940_v8 }
 0x228   :  { %2780 = vmatmul.mubr.msk.f32.vlgmr.msra.gmra.mrb[6].mxu0 %vm118_vm1, %v2779_v11  ;;  %3091 = vmatmul.mubr.msk.f32.vlgmr.msra.gmra.mrb[12].mxu1 %vm118_vm1, %v2779_v11  ;;  %v2783_v11 = vld [vmem:[%s4727_s0 + $0x20] sm:$0xff] }
 0x229   :  { %3495 = vmatpush1.bf16.msra.mxu0 %v4037_v17  ;;  %3526 = vmatpush3.bf16.msra.mxu1 %v4090_v34 }
 0x22a   :  { %3497 = vmatprep.subr.bf16.mxu0 %v4040_v18  ;;  %3527 = vmatprep.subr.bf16.mxu1 %v3940_v8 }
 0x22b   :  { %1304 = vmatprep.mubr.f32.mxu0 %v3939_v5  ;;  %3125 = vmatprep.mubr.msk.f32.mxu1 %vm3941_vm0, %v3939_v5 }
 0x22d   :  { %3499 = vmatpush1.bf16.msra.mxu0 %v4064_v26  ;;  %3529 = vmatpush3.bf16.msra.mxu1 %v4115_v42 }
 0x22e   :  { %3501 = vmatprep.subr.bf16.mxu0 %v4071_v28  ;;  %3530 = vmatprep.subr.bf16.mxu1 %v3940_v8 }
 0x231   :  { %3503 = vmatpush1.bf16.msra.mxu0 %v4099_v37  ;;  %3532 = vmatpush3.bf16.msra.mxu1 %v4148_v52 }
 0x232   :  { %3505 = vmatprep.subr.bf16.mxu0 %v4103_v38  ;;  %3533 = vmatprep.subr.bf16.mxu1 %v3940_v8 }
 0x235   :  { %3507 = vmatpush1.bf16.msra.mxu0 %v4130_v46  ;;  %3535 = vmatpush3.bf16.msra.mxu1 %v4182_v62 }
 0x236   :  { %3509 = vmatprep.subr.bf16.mxu0 %v4136_v48  ;;  %3536 = vmatprep.subr.bf16.mxu1 %v3940_v8 }
 0x239   :  { %3511 = vmatpush1.bf16.msra.mxu0 %v4164_v56  ;;  %3538 = vmatpush3.bf16.msra.mxu1 %v4215_v14 }
 0x23a   :  { %3513 = vmatprep.subr.bf16.mxu0 %v4170_v58  ;;  %3539 = vmatprep.subr.bf16.mxu1 %v3940_v8 }
 0x23d   :  { %3515 = vmatpush1.bf16.msra.mxu0 %v4198_v4  ;;  %3541 = vmatpush3.bf16.msra.mxu1 %v4242_v29 }
 0x23e   :  { %3517 = vmatprep.subr.bf16.mxu0 %v4203_v7  ;;  %3542 = vmatprep.subr.bf16.mxu1 %v3940_v8 }
 0x241   :  { %3519 = vmatpush1.bf16.msra.mxu0 %v4229_v22  ;;  %3544 = vmatpush3.bf16.msra.mxu1 %v4258_v36 }
 0x242   :  { %3521 = vmatprep.subr.bf16.mxu0 %v4233_v23  ;;  %3545 = vmatprep.subr.bf16.mxu1 %v3940_v8 }
 0x245   :  { %3523 = vmatpush1.bf16.msra.mxu0 %v4253_v35  ;;  %3547 = vmatpush3.bf16.msra.mxu1 %v4276_v45 }
 0x246   :  { %3549 = vmatprep.subr.bf16.mxu0 %v4001_v3  ;;  %3552 = vmatprep.subr.bf16.mxu1 %v3940_v8 }
 0x2f7   :  { %v980_v13 = vpop.f32.mrb[4].mxu0  ;;  %v1051_v15 = vpop.f32.mrb[10].mxu1 }
 0x2f8   :  { %v3804_v16 = vadd.f32 %v980_v13, %v4340_v6  ;;  %v982_v19 = vpop.f32.mrb[5].mxu0  ;;  %v3085_v20 = vpop.f32.mrb[11].mxu1  ;;  %v1065_v40 = vadd.f32 %v4349_v30, %v1051_v15 }
 0x2f9   :  { %v3805_v24 = vadd.f32 %v982_v19, %v4342_v12 }
 0x2fa   :  { %v1057_v21 = vmul.f32 0.5, %v3804_v16 }
 0x2fb   :  { %v1058_v27 = vmul.f32 0.5, %v3805_v24 }
 0x2fc   :  { %3854 = vtanh.f32 %v1057_v21 }
 0x2fd   :  { %3856 = vtanh.f32 %v1058_v27 }
 0x306   :  { %v3855_v31 = vpop.eup %3854 }
 0x307   :  { %v1061_v33 = vadd.f32 1.0, %v3855_v31  ;;  %v3857_v47 = vpop.eup %3856 }
 0x308   :  { %v1062_v50 = vadd.f32 1.0, %v3857_v47 }
 0x309   :  { %v1063_v39 = vmul.f32 0.5, %v1061_v33 }
 0x30a   :  { %v1064_v51 = vmul.f32 0.5, %v1062_v50 }
 0x30b   :  { %v1066_v43 = vmul.f32 %v1065_v40, %v1063_v39 }
 0x30c   :  { %v1069_v53 = vsub.f32 1.0, %v1064_v51  ;;  %v1071_v55 = vmul.f32 %v1064_v51, %v4414_v57  ;;  %v1236_v57 = vpop.f32.mrb[12].mxu1 }
 0x30d   :  { %v1067_v49 = vadd.f32 %v1066_v43, %v911_v41  ;;  %v3092_v2 = vpop.f32.mrb[13].mxu1  ;;  %v1237_v41 = vadd.f32 %v1236_v57, %v4351_v32 }
 0x30f   :  { %3858 = vtanh.f32 %v1067_v49 }
 0x319   :  { %v3859_v54 = vpop.eup %3858 }
 0x31a   :  { %v1070_v59 = vmul.f32 %v3859_v54, %v1069_v53 }
 0x31c   :  { %v1072_v60 = vadd.f32 %v1071_v55, %v1070_v59 }
 0x31e   :  { %v1082_v1 = vmul.f32 %v1080_v61, %v1072_v60  ;;  %v1406_v61 = vpop.permute.xlu0 %1405 }
 0x320   :  { %v4471_v44 = vadd.f32 %v1089_v0, %v1082_v1  ;;  %1092 = vst [vmem:[#allocation3 + $0x10] sm:$0xff] %v1082_v1 }
 0x322   :  { %1305 = vmatmul.mubr.f32.vlgmr.msra.gmra.mrb[6].mxu0 %v4471_v44  ;;  %3126 = vmatmul.mubr.f32.vlgmr.msra.gmra.mrb[14].mxu1 %v4471_v44  ;;  %v1415_v1 = vmul.f32 %v1413_v63, %v4471_v44  ;;  %v1739_v63 = vpop.permute.xlu1 %1738 }
 0x323   :  { %3551 = vmatpush1.bf16.msra.mxu0 %v4014_v9  ;;  %3554 = vmatpush3.bf16.msra.mxu1 %v4061_v25 }
 0x324   :  { %1489 = vmatprep.mubr.f32.mxu0 %v3939_v5  ;;  %3132 = vmatprep.mubr.msk.f32.mxu1 %vm3941_vm0, %v3939_v5 }
 0x325   :  { %3556 = vmatprep.subr.bf16.mxu0 %v4016_v10  ;;  %3587 = vmatprep.subr.bf16.mxu1 %v3940_v8 }
 0x326   :  { %2784 = vmatmul.mubr.msk.f32.vlgmr.msra.gmra.mrb[8].mxu0 %vm118_vm1, %v2783_v11  ;;  %3133 = vmatmul.mubr.msk.f32.vlgmr.msra.gmra.mrb[16].mxu1 %vm118_vm1, %v2783_v11  ;;  %v2787_v11 = vld [vmem:[%s4727_s0 + $0x28] sm:$0xff] }
 0x327   :  { %3558 = vmatpush1.bf16.msra.mxu0 %v4037_v17  ;;  %3589 = vmatpush3.bf16.msra.mxu1 %v4090_v34 }
 0x328   :  { %3560 = vmatprep.subr.bf16.mxu0 %v4040_v18  ;;  %3590 = vmatprep.subr.bf16.mxu1 %v3940_v8 }
 0x329   :  { %1630 = vmatprep.mubr.f32.mxu0 %v3939_v5  ;;  %3167 = vmatprep.mubr.msk.f32.mxu1 %vm3941_vm0, %v3939_v5 }
 0x32b   :  { %3562 = vmatpush1.bf16.msra.mxu0 %v4064_v26  ;;  %3592 = vmatpush3.bf16.msra.mxu1 %v4115_v42 }
 0x32c   :  { %3564 = vmatprep.subr.bf16.mxu0 %v4071_v28  ;;  %3593 = vmatprep.subr.bf16.mxu1 %v3940_v8 }
 0x32f   :  { %3566 = vmatpush1.bf16.msra.mxu0 %v4099_v37  ;;  %3595 = vmatpush3.bf16.msra.mxu1 %v4148_v52 }
 0x330   :  { %3568 = vmatprep.subr.bf16.mxu0 %v4103_v38  ;;  %3596 = vmatprep.subr.bf16.mxu1 %v3940_v8 }
 0x333   :  { %3570 = vmatpush1.bf16.msra.mxu0 %v4130_v46  ;;  %3598 = vmatpush3.bf16.msra.mxu1 %v4182_v62 }
 0x334   :  { %3572 = vmatprep.subr.bf16.mxu0 %v4136_v48  ;;  %3599 = vmatprep.subr.bf16.mxu1 %v3940_v8 }
 0x337   :  { %3574 = vmatpush1.bf16.msra.mxu0 %v4164_v56  ;;  %3601 = vmatpush3.bf16.msra.mxu1 %v4215_v14 }
 0x338   :  { %3576 = vmatprep.subr.bf16.mxu0 %v4170_v58  ;;  %3602 = vmatprep.subr.bf16.mxu1 %v3940_v8 }
 0x33b   :  { %3578 = vmatpush1.bf16.msra.mxu0 %v4198_v4  ;;  %3604 = vmatpush3.bf16.msra.mxu1 %v4242_v29 }
 0x33c   :  { %3580 = vmatprep.subr.bf16.mxu0 %v4203_v7  ;;  %3605 = vmatprep.subr.bf16.mxu1 %v3940_v8 }
 0x33f   :  { %3582 = vmatpush1.bf16.msra.mxu0 %v4229_v22  ;;  %3607 = vmatpush3.bf16.msra.mxu1 %v4258_v36 }
 0x340   :  { %3584 = vmatprep.subr.bf16.mxu0 %v4233_v23  ;;  %3608 = vmatprep.subr.bf16.mxu1 %v3940_v8 }
 0x343   :  { %3586 = vmatpush1.bf16.msra.mxu0 %v4253_v35  ;;  %3610 = vmatpush3.bf16.msra.mxu1 %v4276_v45 }
 0x344   :  { %3612 = vmatprep.subr.bf16.mxu0 %v4001_v3  ;;  %3615 = vmatprep.subr.bf16.mxu1 %v3940_v8 }
 0x3f5   :  { %v1306_v13 = vpop.f32.mrb[6].mxu0  ;;  %v1377_v15 = vpop.f32.mrb[14].mxu1 }
 0x3f6   :  { %v3806_v16 = vadd.f32 %v1306_v13, %v4340_v6  ;;  %v1308_v19 = vpop.f32.mrb[7].mxu0  ;;  %v3127_v20 = vpop.f32.mrb[15].mxu1  ;;  %v1391_v40 = vadd.f32 %v4349_v30, %v1377_v15 }
 0x3f7   :  { %v3807_v24 = vadd.f32 %v1308_v19, %v4342_v12 }
 0x3f8   :  { %v1383_v21 = vmul.f32 0.5, %v3806_v16 }
 0x3f9   :  { %v1384_v27 = vmul.f32 0.5, %v3807_v24 }
 0x3fa   :  { %3860 = vtanh.f32 %v1383_v21 }
 0x3fb   :  { %3862 = vtanh.f32 %v1384_v27 }
 0x404   :  { %v3861_v31 = vpop.eup %3860 }
 0x405   :  { %v1387_v33 = vadd.f32 1.0, %v3861_v31  ;;  %v3863_v47 = vpop.eup %3862 }
 0x406   :  { %v1388_v50 = vadd.f32 1.0, %v3863_v47 }
 0x407   :  { %v1389_v39 = vmul.f32 0.5, %v1387_v33 }
 0x408   :  { %v1390_v51 = vmul.f32 0.5, %v1388_v50 }
 0x409   :  { %v1392_v43 = vmul.f32 %v1391_v40, %v1389_v39 }
 0x40a   :  { %v1395_v53 = vsub.f32 1.0, %v1390_v51  ;;  %v1397_v55 = vmul.f32 %v1390_v51, %v4471_v44  ;;  %v1562_v44 = vpop.f32.mrb[16].mxu1 }
 0x40b   :  { %v1393_v49 = vadd.f32 %v1392_v43, %v1237_v41  ;;  %v3134_v57 = vpop.f32.mrb[17].mxu1  ;;  %v1563_v41 = vadd.f32 %v1562_v44, %v4351_v32 }
 0x40d   :  { %3864 = vtanh.f32 %v1393_v49 }
 0x417   :  { %v3865_v54 = vpop.eup %3864 }
 0x418   :  { %v1396_v59 = vmul.f32 %v3865_v54, %v1395_v53 }
 0x41a   :  { %v1398_v60 = vadd.f32 %v1397_v55, %v1396_v59 }
 0x41c   :  { %v1408_v0 = vmul.f32 %v1406_v61, %v1398_v60  ;;  %v1732_v61 = vpop.permute.xlu0 %1731 }
 0x41e   :  { %v4528_v2 = vadd.f32 %v1415_v1, %v1408_v0  ;;  %1418 = vst [vmem:[#allocation3 + $0x18] sm:$0xff] %v1408_v0 }
 0x420   :  { %1631 = vmatmul.mubr.f32.vlgmr.msra.gmra.mrb[8].mxu0 %v4528_v2  ;;  %3168 = vmatmul.mubr.f32.vlgmr.msra.gmra.mrb[18].mxu1 %v4528_v2  ;;  %v1741_v1 = vmul.f32 %v1739_v63, %v4528_v2 }
 0x421   :  { %3614 = vmatpush1.bf16.msra.mxu0 %v4014_v9  ;;  %3617 = vmatpush3.bf16.msra.mxu1 %v4061_v25 }
 0x422   :  { %1815 = vmatprep.mubr.f32.mxu0 %v3939_v5  ;;  %3174 = vmatprep.mubr.msk.f32.mxu1 %vm3941_vm0, %v3939_v5 }
 0x423   :  { %3619 = vmatprep.subr.bf16.mxu0 %v4016_v10  ;;  %3650 = vmatprep.subr.bf16.mxu1 %v3940_v8 }
 0x424   :  { %2788 = vmatmul.mubr.msk.f32.vlgmr.msra.gmra.mrb[10].mxu0 %vm118_vm1, %v2787_v11  ;;  %3175 = vmatmul.mubr.msk.f32.vlgmr.msra.gmra.mrb[20].mxu1 %vm118_vm1, %v2787_v11  ;;  %v2791_v11 = vld [vmem:[%s4727_s0 + $0x30] sm:$0xff] }
 0x425   :  { %3621 = vmatpush1.bf16.msra.mxu0 %v4037_v17  ;;  %3652 = vmatpush3.bf16.msra.mxu1 %v4090_v34 }
 0x426   :  { %3623 = vmatprep.subr.bf16.mxu0 %v4040_v18  ;;  %3653 = vmatprep.subr.bf16.mxu1 %v3940_v8 }
 0x427   :  { %1956 = vmatprep.mubr.f32.mxu0 %v3939_v5  ;;  %3209 = vmatprep.mubr.msk.f32.mxu1 %vm3941_vm0, %v3939_v5 }
 0x429   :  { %3625 = vmatpush1.bf16.msra.mxu0 %v4064_v26  ;;  %3655 = vmatpush3.bf16.msra.mxu1 %v4115_v42 }
 0x42a   :  { %3627 = vmatprep.subr.bf16.mxu0 %v4071_v28  ;;  %3656 = vmatprep.subr.bf16.mxu1 %v3940_v8 }
 0x42d   :  { %3629 = vmatpush1.bf16.msra.mxu0 %v4099_v37  ;;  %3658 = vmatpush3.bf16.msra.mxu1 %v4148_v52 }
 0x42e   :  { %3631 = vmatprep.subr.bf16.mxu0 %v4103_v38  ;;  %3659 = vmatprep.subr.bf16.mxu1 %v3940_v8 }
 0x431   :  { %3633 = vmatpush1.bf16.msra.mxu0 %v4130_v46  ;;  %3661 = vmatpush3.bf16.msra.mxu1 %v4182_v62 }
 0x432   :  { %3635 = vmatprep.subr.bf16.mxu0 %v4136_v48  ;;  %3662 = vmatprep.subr.bf16.mxu1 %v3940_v8 }
 0x435   :  { %3637 = vmatpush1.bf16.msra.mxu0 %v4164_v56  ;;  %3664 = vmatpush3.bf16.msra.mxu1 %v4215_v14 }
 0x436   :  { %3639 = vmatprep.subr.bf16.mxu0 %v4170_v58  ;;  %3665 = vmatprep.subr.bf16.mxu1 %v3940_v8 }
 0x439   :  { %3641 = vmatpush1.bf16.msra.mxu0 %v4198_v4  ;;  %3667 = vmatpush3.bf16.msra.mxu1 %v4242_v29 }
 0x43a   :  { %3643 = vmatprep.subr.bf16.mxu0 %v4203_v7  ;;  %3668 = vmatprep.subr.bf16.mxu1 %v3940_v8 }
 0x43d   :  { %3645 = vmatpush1.bf16.msra.mxu0 %v4229_v22  ;;  %3670 = vmatpush3.bf16.msra.mxu1 %v4258_v36 }
 0x43e   :  { %3647 = vmatprep.subr.bf16.mxu0 %v4233_v23  ;;  %3671 = vmatprep.subr.bf16.mxu1 %v3940_v8 }
 0x441   :  { %3649 = vmatpush1.bf16.msra.mxu0 %v4253_v35  ;;  %3673 = vmatpush3.bf16.msra.mxu1 %v4276_v45 }
 0x442   :  { %3675 = vmatprep.subr.bf16.mxu0 %v4001_v3  ;;  %3678 = vmatprep.subr.bf16.mxu1 %v3940_v8 }
 0x4f3   :  { %v1632_v13 = vpop.f32.mrb[8].mxu0  ;;  %v1703_v15 = vpop.f32.mrb[18].mxu1 }
 0x4f4   :  { %v3808_v16 = vadd.f32 %v1632_v13, %v4340_v6  ;;  %v1634_v19 = vpop.f32.mrb[9].mxu0  ;;  %v3169_v20 = vpop.f32.mrb[19].mxu1  ;;  %v1717_v40 = vadd.f32 %v4349_v30, %v1703_v15 }
 0x4f5   :  { %v3809_v24 = vadd.f32 %v1634_v19, %v4342_v12 }
 0x4f6   :  { %v1709_v21 = vmul.f32 0.5, %v3808_v16 }
 0x4f7   :  { %v1710_v27 = vmul.f32 0.5, %v3809_v24 }
 0x4f8   :  { %3866 = vtanh.f32 %v1709_v21 }
 0x4f9   :  { %3868 = vtanh.f32 %v1710_v27 }
 0x502   :  { %v3867_v31 = vpop.eup %3866 }
 0x503   :  { %v1713_v33 = vadd.f32 1.0, %v3867_v31  ;;  %v3869_v47 = vpop.eup %3868 }
 0x504   :  { %v1714_v50 = vadd.f32 1.0, %v3869_v47 }
 0x505   :  { %v1715_v39 = vmul.f32 0.5, %v1713_v33 }
 0x506   :  { %v1716_v51 = vmul.f32 0.5, %v1714_v50 }
 0x507   :  { %v1718_v43 = vmul.f32 %v1717_v40, %v1715_v39 }
 0x508   :  { %v1721_v53 = vsub.f32 1.0, %v1716_v51  ;;  %v1723_v55 = vmul.f32 %v1716_v51, %v4528_v2  ;;  %v1888_v2 = vpop.f32.mrb[20].mxu1 }
 0x509   :  { %v1719_v49 = vadd.f32 %v1718_v43, %v1563_v41  ;;  %v3176_v44 = vpop.f32.mrb[21].mxu1 }
 0x50a   :  { %v2795_v44 = vld [vmem:[%s4727_s0 + $0x38] sm:$0xff] }
 0x50b   :  { %3870 = vtanh.f32 %v1719_v49 }
 0x515   :  { %v3871_v54 = vpop.eup %3870 }
 0x516   :  { %v1722_v59 = vmul.f32 %v3871_v54, %v1721_v53 }
 0x518   :  { %v1724_v60 = vadd.f32 %v1723_v55, %v1722_v59 }
 0x51a   :  { %v1734_v0 = vmul.f32 %v1732_v61, %v1724_v60  ;;  %v2058_v60 = vpop.permute.xlu0 %2057  ;;  %v2065_v61 = vpop.permute.xlu1 %2064 }
 0x51c   :  { %v4585_v57 = vadd.f32 %v1741_v1, %v1734_v0  ;;  %1744 = vst [vmem:[#allocation3 + $0x20] sm:$0xff] %v1734_v0 }
 0x51e   :  { %1957 = vmatmul.mubr.f32.vlgmr.msra.gmra.mrb[10].mxu0 %v4585_v57  ;;  %3210 = vmatmul.mubr.f32.vlgmr.msra.gmra.mrb[22].mxu1 %v4585_v57  ;;  %v2067_v0 = vmul.f32 %v2065_v61, %v4585_v57 }
 0x51f   :  { %3677 = vmatpush1.bf16.msra.mxu0 %v4014_v9  ;;  %3680 = vmatpush3.bf16.msra.mxu1 %v4061_v25 }
 0x520   :  { %2141 = vmatprep.mubr.f32.mxu0 %v3939_v5  ;;  %3216 = vmatprep.mubr.msk.f32.mxu1 %vm3941_vm0, %v3939_v5 }
 0x521   :  { %3682 = vmatprep.subr.bf16.mxu0 %v4016_v10  ;;  %3713 = vmatprep.subr.bf16.mxu1 %v3940_v8 }
 0x522   :  { %2792 = vmatmul.mubr.msk.f32.vlgmr.msra.gmra.mrb[12].mxu0 %vm118_vm1, %v2791_v11  ;;  %3217 = vmatmul.mubr.msk.f32.vlgmr.msra.gmra.mrb[24].mxu1 %vm118_vm1, %v2791_v11 }
 0x523   :  { %3684 = vmatpush1.bf16.msra.mxu0 %v4037_v17  ;;  %3715 = vmatpush3.bf16.msra.mxu1 %v4090_v34 }
 0x524   :  { %3686 = vmatprep.subr.bf16.mxu0 %v4040_v18  ;;  %3716 = vmatprep.subr.bf16.mxu1 %v3940_v8 }
 0x525   :  { %2282 = vmatprep.mubr.f32.mxu0 %v3939_v5  ;;  %3251 = vmatprep.mubr.msk.f32.mxu1 %vm3941_vm0, %v3939_v5 }
 0x527   :  { %3688 = vmatpush1.bf16.msra.mxu0 %v4064_v26  ;;  %3718 = vmatpush3.bf16.msra.mxu1 %v4115_v42 }
 0x528   :  { %3690 = vmatprep.subr.bf16.mxu0 %v4071_v28  ;;  %3719 = vmatprep.subr.bf16.mxu1 %v3940_v8 }
 0x52b   :  { %3692 = vmatpush1.bf16.msra.mxu0 %v4099_v37  ;;  %3721 = vmatpush3.bf16.msra.mxu1 %v4148_v52 }
 0x52c   :  { %3694 = vmatprep.subr.bf16.mxu0 %v4103_v38  ;;  %3722 = vmatprep.subr.bf16.mxu1 %v3940_v8 }
 0x52f   :  { %3696 = vmatpush1.bf16.msra.mxu0 %v4130_v46  ;;  %3724 = vmatpush3.bf16.msra.mxu1 %v4182_v62 }
 0x530   :  { %3698 = vmatprep.subr.bf16.mxu0 %v4136_v48  ;;  %3725 = vmatprep.subr.bf16.mxu1 %v3940_v8 }
 0x533   :  { %3700 = vmatpush1.bf16.msra.mxu0 %v4164_v56  ;;  %3727 = vmatpush3.bf16.msra.mxu1 %v4215_v14 }
 0x534   :  { %3702 = vmatprep.subr.bf16.mxu0 %v4170_v58  ;;  %3728 = vmatprep.subr.bf16.mxu1 %v3940_v8 }
 0x537   :  { %3704 = vmatpush1.bf16.msra.mxu0 %v4198_v4  ;;  %3730 = vmatpush3.bf16.msra.mxu1 %v4242_v29 }
 0x538   :  { %3706 = vmatprep.subr.bf16.mxu0 %v4203_v7  ;;  %3731 = vmatprep.subr.bf16.mxu1 %v3940_v8 }
 0x53b   :  { %3708 = vmatpush1.bf16.msra.mxu0 %v4229_v22  ;;  %3733 = vmatpush3.bf16.msra.mxu1 %v4258_v36 }
 0x53c   :  { %3710 = vmatprep.subr.bf16.mxu0 %v4233_v23  ;;  %3734 = vmatprep.subr.bf16.mxu1 %v3940_v8 }
 0x53f   :  { %3712 = vmatpush1.bf16.msra.mxu0 %v4253_v35  ;;  %3736 = vmatpush3.bf16.msra.mxu1 %v4276_v45 }
 0x540   :  { %3738 = vmatprep.subr.bf16.mxu0 %v4001_v3  ;;  %3741 = vmatprep.subr.bf16.mxu1 %v3940_v8  ;;  %v1889_v3 = vadd.f32 %v1888_v2, %v4351_v32 }
 0x5f1   :  { %v1958_v13 = vpop.f32.mrb[10].mxu0  ;;  %v2029_v15 = vpop.f32.mrb[22].mxu1 }
 0x5f2   :  { %v3810_v16 = vadd.f32 %v1958_v13, %v4340_v6  ;;  %v1960_v19 = vpop.f32.mrb[11].mxu0  ;;  %v3211_v20 = vpop.f32.mrb[23].mxu1  ;;  %v2043_v40 = vadd.f32 %v4349_v30, %v2029_v15 }
 0x5f3   :  { %v3811_v24 = vadd.f32 %v1960_v19, %v4342_v12 }
 0x5f4   :  { %v2035_v21 = vmul.f32 0.5, %v3810_v16 }
 0x5f5   :  { %v2036_v27 = vmul.f32 0.5, %v3811_v24 }
 0x5f6   :  { %3872 = vtanh.f32 %v2035_v21 }
 0x5f7   :  { %3874 = vtanh.f32 %v2036_v27 }
 0x600   :  { %v3873_v31 = vpop.eup %3872 }
 0x601   :  { %v2039_v33 = vadd.f32 1.0, %v3873_v31  ;;  %v3875_v43 = vpop.eup %3874 }
 0x602   :  { %v2040_v49 = vadd.f32 1.0, %v3875_v43 }
 0x603   :  { %v2041_v39 = vmul.f32 0.5, %v2039_v33 }
 0x604   :  { %v2042_v50 = vmul.f32 0.5, %v2040_v49 }
 0x605   :  { %v2044_v41 = vmul.f32 %v2043_v40, %v2041_v39  ;;  %v3890_v40 = vld [vmem:[%s4733_s6] ss:$0 sm:$0xff]  ;;  %s3944_s6 = smov [#allocation5]  }
 0x606   :  { %v2047_v51 = vsub.f32 1.0, %v2042_v50  ;;  %v2049_v59 = vmul.f32 %v2042_v50, %v4585_v57  ;;  %v2214_v57 = vpop.f32.mrb[24].mxu1  ;;  %s2755_s3 = sshll.u32 %s3944_s6, 4  ;;  %s2756_s3 = int_to_ptr.vmem [resolvable:$true] %s2755_s3 }
 0x607   :  { %v2045_v47 = vadd.f32 %v2044_v41, %v1889_v3  ;;  %v3218_v2 = vpop.f32.mrb[25].mxu1 }
 0x609   :  { %3876 = vtanh.f32 %v2045_v47 }
 0x613   :  { %v3877_v53 = vpop.eup %3876 }
 0x614   :  { %v2048_v54 = vmul.f32 %v3877_v53, %v2047_v51 }
 0x616   :  { %v2050_v55 = vadd.f32 %v2049_v59, %v2048_v54 }
 0x618   :  { %v2060_v63 = vmul.f32 %v2058_v60, %v2050_v55 }
 0x61a   :  { %v4642_v1 = vadd.f32 %v2067_v0, %v2060_v63  ;;  %2070 = vst [vmem:[#allocation3 + $0x28] sm:$0xff] %v2060_v63 }
 0x61c   :  { %2283 = vmatmul.mubr.f32.vlgmr.msra.gmra.mrb[12].mxu0 %v4642_v1  ;;  %3252 = vmatmul.mubr.f32.vlgmr.msra.gmra.mrb[26].mxu1 %v4642_v1 }
 0x61d   :  { %3740 = vmatpush1.bf16.msra.mxu0 %v4014_v9  ;;  %3743 = vmatpush3.bf16.msra.mxu1 %v4061_v25 }
 0x61e   :  { %2467 = vmatprep.mubr.f32.mxu0 %v3939_v5  ;;  %3258 = vmatprep.mubr.msk.f32.mxu1 %vm3941_vm0, %v3939_v5 }
 0x61f   :  { %3745 = vmatprep.subr.bf16.mxu0 %v4016_v10  ;;  %3776 = vmatprep.subr.bf16.mxu1 %v3940_v8 }
 0x620   :  { %2796 = vmatmul.mubr.msk.f32.vlgmr.msra.gmra.mrb[14].mxu0 %vm118_vm1, %v2795_v44  ;;  %3259 = vmatmul.mubr.msk.f32.vlgmr.msra.gmra.mrb[28].mxu1 %vm118_vm1, %v2795_v44 }
 0x621   :  { %3747 = vmatpush1.bf16.msra.mxu0 %v4037_v17  ;;  %3778 = vmatpush3.bf16.msra.mxu1 %v4090_v34 }
 0x622   :  { %3749 = vmatprep.subr.bf16.mxu0 %v4040_v18  ;;  %3779 = vmatprep.subr.bf16.mxu1 %v3940_v8 }
 0x623   :  { %2608 = vmatprep.mubr.f32.mxu0 %v3939_v5  ;;  %3293 = vmatprep.mubr.msk.f32.mxu1 %vm3941_vm0, %v3939_v5 }
 0x625   :  { %3751 = vmatpush1.bf16.msra.mxu0 %v4064_v26  ;;  %3781 = vmatpush3.bf16.msra.mxu1 %v4115_v42  ;;  %v2215_v42 = vadd.f32 %v2214_v57, %v4351_v32 }
 0x626   :  { %3753 = vmatprep.subr.bf16.mxu0 %v4071_v28  ;;  %3782 = vmatprep.subr.bf16.mxu1 %v3940_v8 }
 0x629   :  { %3755 = vmatpush1.bf16.msra.mxu0 %v4099_v37  ;;  %3784 = vmatpush3.bf16.msra.mxu1 %v4148_v52 }
 0x62a   :  { %3757 = vmatprep.subr.bf16.mxu0 %v4103_v38  ;;  %3785 = vmatprep.subr.bf16.mxu1 %v3940_v8 }
 0x62d   :  { %3759 = vmatpush1.bf16.msra.mxu0 %v4130_v46  ;;  %3787 = vmatpush3.bf16.msra.mxu1 %v4182_v62 }
 0x62e   :  { %3761 = vmatprep.subr.bf16.mxu0 %v4136_v48  ;;  %3788 = vmatprep.subr.bf16.mxu1 %v3940_v8 }
 0x631   :  { %3763 = vmatpush1.bf16.msra.mxu0 %v4164_v56  ;;  %3790 = vmatpush3.bf16.msra.mxu1 %v4215_v14 }
 0x632   :  { %3765 = vmatprep.subr.bf16.mxu0 %v4170_v58  ;;  %3791 = vmatprep.subr.bf16.mxu1 %v3940_v8 }
 0x635   :  { %3767 = vmatpush1.bf16.msra.mxu0 %v4198_v4  ;;  %3793 = vmatpush3.bf16.msra.mxu1 %v4242_v29  ;;  %v2391_v29 = vpop.permute.xlu1 %2390 }
 0x636   :  { %3769 = vmatprep.subr.bf16.mxu0 %v4203_v7  ;;  %3794 = vmatprep.subr.bf16.mxu1 %v3940_v8 }
 0x639   :  { %3771 = vmatpush1.bf16.msra.mxu0 %v4229_v22  ;;  %3796 = vmatpush3.bf16.msra.mxu1 %v4258_v36  ;;  %v2393_v36 = vmul.f32 %v2391_v29, %v4642_v1  ;;  %v2717_v60 = vpop.permute.xlu1 %2716 }
 0x63a   :  { %3773 = vmatprep.subr.bf16.mxu0 %v4233_v23  ;;  %3797 = vmatprep.subr.bf16.mxu1 %v3940_v8  ;;  %v2384_v23 = vpop.permute.xlu0 %2383 }
 0x63d   :  { %3775 = vmatpush1.bf16.msra.mxu0 %v4253_v35  ;;  %3799 = vmatpush3.bf16.msra.mxu1 %v4276_v45 }
 0x63e   :  { %v2710_v59 = vpop.permute.xlu0 %2709 }
 0x642   :  { %v2733_v0 = vpop.permute.xlu0 %2732 }
 0x6ef   :  { %v2284_v5 = vpop.f32.mrb[12].mxu0  ;;  %v2355_v9 = vpop.f32.mrb[26].mxu1 }
 0x6f0   :  { %v3812_v10 = vadd.f32 %v2284_v5, %v4340_v6  ;;  %v2286_v17 = vpop.f32.mrb[13].mxu0  ;;  %v3253_v18 = vpop.f32.mrb[27].mxu1  ;;  %v2369_v8 = vadd.f32 %v4349_v30, %v2355_v9 }
 0x6f1   :  { %v3813_v26 = vadd.f32 %v2286_v17, %v4342_v12 }
 0x6f2   :  { %v2361_v25 = vmul.f32 0.5, %v3812_v10 }
 0x6f3   :  { %v2362_v28 = vmul.f32 0.5, %v3813_v26  ;;  %v2540_v30 = vpop.f32.mrb[28].mxu1 }
 0x6f4   :  { %3878 = vtanh.f32 %v2361_v25  ;;  %v3260_v11 = vpop.f32.mrb[29].mxu1  ;;  %v2541_v41 = vadd.f32 %v2540_v30, %v4351_v32 }
 0x6f5   :  { %3880 = vtanh.f32 %v2362_v28 }
 0x6fe   :  { %v3879_v34 = vpop.eup %3878 }
 0x6ff   :  { %v2365_v37 = vadd.f32 1.0, %v3879_v34  ;;  %v3881_v48 = vpop.eup %3880 }
 0x700   :  { %v2366_v56 = vadd.f32 1.0, %v3881_v48 }
 0x701   :  { %v2367_v38 = vmul.f32 0.5, %v2365_v37 }
 0x702   :  { %v2368_v58 = vmul.f32 0.5, %v2366_v56 }
 0x703   :  { %v2370_v46 = vmul.f32 %v2369_v8, %v2367_v38 }
 0x704   :  { %v2373_v62 = vsub.f32 1.0, %v2368_v58  ;;  %v2375_v14 = vmul.f32 %v2368_v58, %v4642_v1 }
 0x705   :  { %v2371_v52 = vadd.f32 %v2370_v46, %v2215_v42 }
 0x707   :  { %3882 = vtanh.f32 %v2371_v52 }
 0x711   :  { %v3883_v4 = vpop.eup %3882 }
 0x712   :  { %v2374_v7 = vmul.f32 %v3883_v4, %v2373_v62 }
 0x714   :  { %v2376_v22 = vadd.f32 %v2375_v14, %v2374_v7 }
 0x716   :  { %v2386_v35 = vmul.f32 %v2384_v23, %v2376_v22 }
 0x718   :  { %v2394_v45 = vadd.f32 %v2393_v36, %v2386_v35  ;;  %2396 = vst [vmem:[#allocation3 + $0x30] sm:$0xff] %v2386_v35 }
 0x71a   :  { %2609 = vmatmul.mubr.f32.vlgmr.msra.gmra.mrb[14].mxu0 %v2394_v45  ;;  %3294 = vmatmul.mubr.f32.vlgmr.msra.gmra.mrb[30].mxu1 %v2394_v45  ;;  %v2719_v63 = vmul.f32 %v2717_v60, %v2394_v45 }
 0x7ed   :  { %v2610_v13 = vpop.f32.mrb[14].mxu0  ;;  %v2681_v15 = vpop.f32.mrb[30].mxu1 }
 0x7ee   :  { %v3814_v16 = vadd.f32 %v2610_v13, %v4340_v6  ;;  %v2612_v19 = vpop.f32.mrb[15].mxu0  ;;  %v3295_v20 = vpop.f32.mrb[31].mxu1  ;;  %v2695_v3 = vadd.f32 %v3890_v40, %v2681_v15 }
 0x7ef   :  { %v3815_v24 = vadd.f32 %v2612_v19, %v4342_v12 }
 0x7f0   :  { %v2687_v21 = vmul.f32 0.5, %v3814_v16 }
 0x7f1   :  { %v2688_v27 = vmul.f32 0.5, %v3815_v24 }
 0x7f2   :  { %3884 = vtanh.f32 %v2687_v21 }
 0x7f3   :  { %3886 = vtanh.f32 %v2688_v27 }
 0x7fc   :  { %v3885_v31 = vpop.eup %3884 }
 0x7fd   :  { %v2691_v33 = vadd.f32 1.0, %v3885_v31  ;;  %v3887_v6 = vpop.eup %3886 }
 0x7fe   :  { %v2692_v49 = vadd.f32 1.0, %v3887_v6 }
 0x7ff   :  { %v2693_v39 = vmul.f32 0.5, %v2691_v33 }
 0x800   :  { %v2694_v50 = vmul.f32 0.5, %v2692_v49 }
 0x801   :  { %v2696_v43 = vmul.f32 %v2695_v3, %v2693_v39 }
 0x802   :  { %v2699_v12 = vsub.f32 1.0, %v2694_v50  ;;  %v2701_v54 = vmul.f32 %v2694_v50, %v2394_v45 }
 0x803   :  { %v2697_v47 = vadd.f32 %v2696_v43, %v2541_v41 }
 0x805   :  { %3888 = vtanh.f32 %v2697_v47 }
 0x80f   :  { %v3889_v51 = vpop.eup %3888 }
 0x810   :  { %v2700_v53 = vmul.f32 %v3889_v51, %v2699_v12 }
 0x812   :  { %v2702_v55 = vadd.f32 %v2701_v54, %v2700_v53 }
 0x814   :  { %v2712_v61 = vmul.f32 %v2710_v59, %v2702_v55 }
 0x816   :  { %2722 = vst [vmem:[#allocation3 + $0x38] sm:$0xff] %v2712_v61  ;;  %v2720_v32 = vadd.f32 %v2719_v63, %v2712_v61 }
 0x817   :  { %3902 = shalt.err (!%p3899_p4)
}
 0x818   :  { %s3903_s23 = scalar_lea.hbm %s4734_s7, 1024 }
 0x819   :  { %p3904_p5 = scmp.ne.s32.totalorder %s4734_s7, %s3903_s23  ;;  %p3907_p6 = scmp.lt.u32.totalorder %s3903_s23, %s4734_s7 }
 0x81b   :  { %p3909_p7 = pnand %p3907_p6, %p3904_p5 }
 0x81d   :  { %3912 = shalt.err (!%p3909_p7)
}
 0x81e   :  { %s3945_s26 = smov 128   ;;  %s3946_s27 = smov 8   ;;  %v2735_v1 = vmul.f32 %v2733_v0, %v2720_v32 }
 0x81f   :  { %2748 = dma.vmem_to_hbm [thread:$0]  %s2743_s19, 1024, %s4734_s7, [#allocation4], %s3945_s26, %s3945_s26, %s3946_s27  }
 0x820   :  { %2736 = vst [vmem:[#allocation5] sm:$0xff] %v2735_v1  ;;  %s3913_s29 = scalar_lea.vmem %s2756_s3, 128  ;;  %p3918_p9 = scmp.lt.s32.totalorder %s2756_s3, %s2756_s3 }
 0x821   :  { %p3914_p8 = scmp.ne.s32.totalorder %s2756_s3, %s3913_s29  ;;  %p3919_p10 = scmp.lt.s32.totalorder %s3913_s29, %s3913_s29 }
 0x823   :  { %p3920_p11 = por %p3919_p10, %p3918_p9 }
 0x825   :  { %p3921_p12 = pnand %p3920_p11, %p3914_p8 }
 0x827   :  { %3924 = shalt.err (!%p3921_p12)
}
 0x828   :  { %s3925_s10 = scalar_lea.hbm %s4735_s8, 128 }
 0x829   :  { %p3926_p13 = scmp.ne.s32.totalorder %s4735_s8, %s3925_s10  ;;  %p3929_p0 = scmp.lt.u32.totalorder %s3925_s10, %s4735_s8 }
 0x82b   :  { %p3931_p1 = pnand %p3929_p0, %p3926_p13 }
 0x82d   :  { %3934 = shalt.err (!%p3931_p1)
}
 0x82e   :  { %2758 = dma.vmem_to_hbm [thread:$0]  %s2756_s3, 128, %s4735_s8, [#allocation6]  }
 0x82f   :  { %3935 = dma.done.wait [#allocation4], 1024  }
 0x830   :  { %3936 = vsyncadd [#allocation4], 4294966272 }
 0x831   :  { %3937 = dma.done.wait [#allocation6], 128  }
 0x832   :  { %3938 = vsyncadd [#allocation6], 4294967168 }
 0x833   :  { %2765 = vsyncpa [#allocation4], 1 }
 0x834   :  { %2766 = vsyncpa [#allocation6], 1 }

</bundles_post_ra>
